<compile_context>
chip_gen: v5e
topology: v5e:2x2
jax: 0.10.0
libtpu: 0.0.40
codegen_flags: <defaults>
</compile_context>

<pallas_src>
import functools
import math

import jax
import jax.numpy as jnp
from jax import lax
from jax.experimental import pallas as pl
from jax.experimental.pallas import tpu as pltpu


def _cross_attn_project_kernel(x_ref, wproj_ref, bproj_ref, wv_ref, bv_ref, keep_ref,
                               out_ref, *, H, K, DS):
    """One (layer, batch, row-tile) grid step.

    x_ref:     [RT, E]     bf16
    wproj_ref: [E, H*K]    bf16   fused  Wk^T @ blockdiag(W_h^T)
    bproj_ref: [1, H*K]    f32
    wv_ref:    [E, H*DS]   bf16   Wv^T with a per-head zero "ones" column (bias = 1)
    bv_ref:    [1, H*DS]   f32
    keep_ref:  [RT, 1]     f32    keep * proj_dim**-0.5 (0.0 on padding rows)
    out_ref:   [2K, H*DS]  f32    resident accumulator over the row-tile axis;
                                  per head: cols [0, D) = s rows, col D = z.
    """
    r = pl.program_id(2)

    @pl.when(r == 0)
    def _init():
        out_ref[...] = jnp.zeros_like(out_ref)

    # Stage 1: fused projections — two MXU matmuls with contraction E (bf16 in / f32 acc).
    x = x_ref[...]
    proj = jnp.dot(x, wproj_ref[...], preferred_element_type=jnp.float32) + bproj_ref[...]  # [RT, H*K]
    v = jnp.dot(x, wv_ref[...], preferred_element_type=jnp.float32) + bv_ref[...]           # [RT, H*DS]

    # Random-feature map + key-padding mask; the K**-0.5 scale is folded into keep wrapper-side.
    gate = keep_ref[...]                                                                     # [RT, 1]
    phi_sin = (jnp.sin(proj) * gate).astype(jnp.bfloat16)   # mask applied before the bf16 cast
    phi_cos = (jnp.cos(proj) * gate).astype(jnp.bfloat16)   # -> padded rows stay exactly zero
    v_b = v.astype(jnp.bfloat16)

    # Stage 2: one MXU dot per head -> [2K, DS] already in the final row layout (sin rows then
    # cos rows).  The "ones" column of v makes column D equal z_h = sum_s phi_h, so the z
    # reduction runs on the MXU (which has slack) instead of the VALU.
    dn = (((0,), (0,)), ((), ()))          # contract the row (seq) axis of both operands
    if DS % 128 == 0:
        # Lane-aligned per-head stride: accumulate straight into the output slice per head.
        for h in range(H):
            phi_h = jnp.concatenate([phi_sin[:, h * K:(h + 1) * K],
                                     phi_cos[:, h * K:(h + 1) * K]], axis=1)                 # [RT, 2K]
            blk = lax.dot_general(phi_h, v_b[:, h * DS:(h + 1) * DS], dn,
                                  preferred_element_type=jnp.float32)                        # [2K, DS]
            out_ref[:, h * DS:(h + 1) * DS] += blk
    else:
        blocks = []
        for h in range(H):
            phi_h = jnp.concatenate([phi_sin[:, h * K:(h + 1) * K],
                                     phi_cos[:, h * K:(h + 1) * K]], axis=1)                 # [RT, 2K]
            blocks.append(lax.dot_general(phi_h, v_b[:, h * DS:(h + 1) * DS], dn,
                                          preferred_element_type=jnp.float32))               # [2K, DS]
        out_ref[...] += jnp.concatenate(blocks, axis=1)     # lane concat only; no sublane copy


def _vmem_capacity_bytes():
    """Physical per-core VMEM; conservative default if the trace-time query is unavailable."""
    try:
        info = pltpu.get_tpu_info()
        cap = getattr(info, "vmem_capacity_bytes", None)
        if cap:
            return int(cap)
    except Exception:
        pass
    return 64 * 1024 * 1024   # v7x per-TC size (safe lower bound; v5e/v6e have 128 MiB)


def _vmem_footprint(RT, E, HK, HDS, K, weight_bufs):
    """Approximate per-step VMEM bytes (streaming inputs double-buffered, padded estimates)."""
    lane = 128
    x_t = 2 * RT * E * 2                               # bf16 x tile, double-buffered
    keep_t = 2 * RT * lane * 4                         # f32 keep tile (lane-padded), double-buffered
    w_t = weight_bufs * E * (HK + HDS) * 2             # bf16 fused key + value weights
    b_t = weight_bufs * 8 * (HK + HDS) * 4             # f32 biases (sublane-padded)
    out_t = 2 * max(2 * K, 8) * max(HDS, lane) * 4     # f32 resident output block
    return x_t + keep_t + w_t + b_t + out_t


def _choose_row_tile(S, E, HK, HDS, K, vmem_budget, requested):
    """Rows per grid step.  Prefer large, MXU-friendly tiles (multiples of 256, <= 1024)."""
    if requested is not None:
        return int(requested)
    per_row = 2 * E * 2 + 2 * 128 * 4
    fixed = _vmem_footprint(0, E, HK, HDS, K, weight_bufs=2)
    avail = max(vmem_budget // 2 - fixed, 8 * per_row)
    cap = max(8, min(int(avail // per_row), 1024))
    if S <= cap:
        return S
    best = None
    for rt in range(cap - cap % 8, 7, -8):
        if S % rt == 0:
            if rt % 256 == 0:
                return rt
            if best is None:
                best = rt
    return best if best is not None else S


def _make_keep(key_padding_mask, B, S, K):
    """[B, S, 1] f32: (1 - mask) * proj_dim**-0.5 (scale folded in so the kernel does one mul)."""
    if key_padding_mask is None:
        return jnp.full((B, S, 1), K ** -0.5, jnp.float32)
    return (1.0 - key_padding_mask.astype(jnp.float32))[:, :, None] * (K ** -0.5)


def _build_fused_params(wk, bk, wv, bv, sigma, rand_mat, tau, *, H, D, K, DS):
    """Fold build_random_matrices into the key projection and append the z "ones" column."""
    L, E, _ = wk.shape
    f32 = jnp.float32
    hi = lax.Precision.HIGHEST
    wk_t = jnp.transpose(wk, (0, 2, 1)).astype(f32)                    # x @ wk_t == x @ Wk^T
    wv_t = jnp.transpose(wv, (0, 2, 1)).astype(f32)
    built = sigma.astype(f32) * rand_mat.astype(f32)[None] / tau       # [L, H, K, D]
    wproj = jnp.einsum('lehd,lhkd->lehk', wk_t.reshape(L, E, H, D), built,
                       precision=hi).reshape(L, E, H * K)
    bproj = jnp.einsum('lhd,lhkd->lhk', bk.astype(f32).reshape(L, H, D), built,
                       precision=hi).reshape(L, H * K)
    # Value projection, per-head stride DS: D value columns, one "ones" column (weight 0,
    # bias 1) that makes the stage-2 matmul emit z = sum_s phi, then zero padding up to DS.
    pad = DS - D
    wv_aug = jnp.concatenate([wv_t.reshape(L, E, H, D), jnp.zeros((L, E, H, pad), f32)],
                             axis=-1).reshape(L, E, H * DS)
    bv_aug = jnp.concatenate([bv.astype(f32).reshape(L, H, D), jnp.ones((L, H, 1), f32),
                              jnp.zeros((L, H, pad - 1), f32)], axis=-1).reshape(L, H * DS)
    return wproj, bproj, wv_aug, bv_aug, built


def cross_attention_project(encoder_output, wk, bk, wv, bv, sigma, rand_mat,
                            key_padding_mask, *, num_heads, head_dim, proj_dim, tau,
                            row_tile=None, head_stride=None):
    """encoder_output: [S, B, E]; wk/wv: [L, E, E] (torch [out,in]); bk/bv: [L, E];
    sigma: [L, H, 1, D]; rand_mat: [H, K, D]; key_padding_mask: [B, S] bool or None.
    Returns (s, z, built_random_matrices, tau) with s: [L,B,H,2K,D], z: [L,B,H,2K]."""
    S, B, E = encoder_output.shape
    L = wk.shape[0]
    H, D, K = num_heads, head_dim, proj_dim
    assert H * D == E
    # Per-head output column stride (D value cols + 1 z col); pass head_stride=128-multiple in
    # production when D+1 would break lane alignment of the per-head slices.
    DS = (D + 1) if head_stride is None else int(head_stride)
    assert DS >= D + 1

    capacity = _vmem_capacity_bytes()
    budget = int(capacity * 0.75)
    RT = _choose_row_tile(S, E, H * K, H * DS, K, budget, row_tile)
    assert S % RT == 0 and (RT == S or RT % 8 == 0)
    R = S // RT

    wproj, bproj, wv_aug, bv_aug, built = _build_fused_params(
        wk, bk, wv, bv, sigma, rand_mat, tau, H=H, D=D, K=K, DS=DS)

    # Batch-major activations, bf16 for the MXU (accumulation stays f32 in-kernel).
    x = jnp.transpose(encoder_output, (1, 0, 2)).astype(jnp.bfloat16)          # [B, S, E]
    keep = _make_keep(key_padding_mask, B, S, K)                               # [B, S, 1]

    wproj_bf = wproj.astype(jnp.bfloat16)                                      # [L, E, H*K]
    wv_bf = wv_aug.astype(jnp.bfloat16)                                        # [L, E, H*DS]
    bproj2 = bproj.reshape(L, 1, H * K)
    bv2 = bv_aug.reshape(L, 1, H * DS)

    kernel = functools.partial(_cross_attn_project_kernel, H=H, K=K, DS=DS)

    flops = L * B * S * (2 * E * (H * K + H * DS) + 4 * K * H * DS)
    transcendentals = 2 * L * B * S * H * K
    bytes_accessed = (L * B * S * E * 2                       # x re-streamed per layer (bf16)
                      + L * E * (H * K + H * DS) * 2          # fused key + value weights (bf16)
                      + L * (H * K + H * DS) * 4 + B * S * 4  # biases + mask
                      + L * B * 2 * K * H * DS * 4)           # fused s/z output (f32)
    cost = pl.CostEstimate(flops=flops, transcendentals=transcendentals,
                           bytes_accessed=bytes_accessed)

    footprint = _vmem_footprint(RT, E, H * K, H * DS, K, weight_bufs=1)
    vmem_limit = int(max(32 << 20, min(budget, 2 * footprint + (8 << 20))))
    vmem_limit = int(max(vmem_limit, footprint + (4 << 20)))

    def build_call(single_buffer_weights):
        wkw = dict(pipeline_mode=pl.Buffered(1)) if single_buffer_weights else {}
        grid_spec = pltpu.PrefetchScalarGridSpec(
            num_scalar_prefetch=0,
            # L outermost: per-layer weights DMA'd once per layer; row-tile (reduction) innermost.
            grid=(L, B, R),
            in_specs=[
                pl.BlockSpec((None, RT, E), lambda l, b, r: (b, r, 0)),             # x row tile
                pl.BlockSpec((None, E, H * K), lambda l, b, r: (l, 0, 0), **wkw),   # fused Wproj
                pl.BlockSpec((None, 1, H * K), lambda l, b, r: (l, 0, 0)),          # fused bias
                pl.BlockSpec((None, E, H * DS), lambda l, b, r: (l, 0, 0), **wkw),  # Wv^T (+ ones col)
                pl.BlockSpec((None, 1, H * DS), lambda l, b, r: (l, 0, 0)),         # bv (+ 1.0)
                pl.BlockSpec((None, RT, 1), lambda l, b, r: (b, r, 0)),             # keep mask tile
            ],
            out_specs=pl.BlockSpec((None, None, 2 * K, H * DS), lambda l, b, r: (l, b, 0, 0)),
        )
        return pl.pallas_call(
            kernel,
            out_shape=jax.ShapeDtypeStruct((L, B, 2 * K, H * DS), jnp.float32),
            grid_spec=grid_spec,
            compiler_params=pltpu.CompilerParams(
                # (L, B) parallel -> sharded across the 2 TensorCores on v7x (keep L*B >= 2).
                dimension_semantics=("parallel", "parallel", "arbitrary"),
                vmem_limit_bytes=vmem_limit),
            cost_estimate=cost,
        )

    args = (x, wproj_bf, bproj2, wv_bf, bv2, keep)
    try:
        # Single-buffer the layer-resident weights (block index changes only L times).
        out = build_call(True)(*args)
    except Exception:
        # pipeline_mode / Buffered(1) unsupported on this jax version: default double-buffering.
        out = build_call(False)(*args)

    # Back to the PyTorch layouts.
    out = out.reshape(L, B, 2 * K, H, DS)
    s = out[..., :D].transpose(0, 1, 3, 2, 4)               # [L, B, H, 2K, D]
    z = out[..., D].transpose(0, 1, 3, 2)                   # [L, B, H, 2K]
    return s, z, built, float(tau)


def _reference(encoder_output, wk, bk, wv, bv, sigma, rand_mat, mask, *, H, D, K, tau):
    """Pure-f32 JAX mirror of the PyTorch forward (eval mode)."""
    S, B, E = encoder_output.shape
    L = wk.shape[0]
    hi = lax.Precision.HIGHEST
    x = encoder_output.astype(jnp.float32)
    k = jnp.einsum('sbe,lfe->lsbf', x, wk, precision=hi) + bk[:, None, None, :]
    v = jnp.einsum('sbe,lfe->lsbf', x, wv, precision=hi) + bv[:, None, None, :]
    k = k.reshape(L, S, B, H, D)
    v = v.reshape(L, S, B, H, D)
    W = sigma * rand_mat[None] / tau                                           # [L, H, K, D]
    proj = jnp.einsum('lsbhd,lhkd->lsbhk', k, W, precision=hi)
    phi = jnp.concatenate([jnp.sin(proj), jnp.cos(proj)], axis=-1) * (K ** -0.5)
    if mask is not None:
        keep = (~mask.astype(bool)).astype(jnp.float32).T[None, :, :, None, None]
        phi = phi * keep
    s = jnp.einsum('lsbhk,lsbhd->lbhkd', phi, v, precision=hi)
    z = jnp.sum(phi, axis=1)
    return s, z


def _kernel_mirror(encoder_output, wproj, bproj, wv_aug, bv_aug, key_padding_mask,
                   *, H, D, K, DS):
    """Pure-JAX mirror of the kernel math (same fused weights + bf16 rounding points)."""
    S, B, E = encoder_output.shape
    L = wproj.shape[0]
    hi = lax.Precision.HIGHEST
    xf = jnp.transpose(encoder_output, (1, 0, 2)).astype(jnp.bfloat16).astype(jnp.float32)
    wpf = wproj.astype(jnp.bfloat16).astype(jnp.float32)
    wvf = wv_aug.astype(jnp.bfloat16).astype(jnp.float32)
    proj = jnp.einsum('bse,lej->lbsj', xf, wpf, precision=hi) + bproj[:, None, None, :]
    v = jnp.einsum('bse,lef->lbsf', xf, wvf, precision=hi) + bv_aug[:, None, None, :]
    gate = _make_keep(key_padding_mask, B, S, K)[None]                         # [1, B, S, 1]
    ps = (jnp.sin(proj) * gate).reshape(L, B, S, H, K).astype(jnp.bfloat16).astype(jnp.float32)
    pc = (jnp.cos(proj) * gate).reshape(L, B, S, H, K).astype(jnp.bfloat16).astype(jnp.float32)
    vh = v.reshape(L, B, S, H, DS).astype(jnp.bfloat16).astype(jnp.float32)
    out = jnp.concatenate(
        [jnp.einsum('lbshk,lbshd->lbhkd', ps, vh, precision=hi),
         jnp.einsum('lbshk,lbshd->lbhkd', pc, vh, precision=hi)], axis=3)      # [L,B,H,2K,DS]
    return out[..., :D], out[..., D]


def _xavier_uniform(key, out_f, in_f, gain):
    a = gain * math.sqrt(6.0 / (in_f + out_f))
    return jax.random.uniform(key, (out_f, in_f), jnp.float32, -a, a)


if __name__ == "__main__":
    # small shapes consistent with the module
    num_layers, embed_dim, num_heads, head_dim, proj_dim = 2, 32, 4, 8, 16
    seq_len, bsz, tau = 16, 2, 1.0
    L, E, H, D, K = num_layers, embed_dim, num_heads, head_dim, proj_dim

    root = jax.random.PRNGKey(0)
    keys = jax.random.split(root, 2 * L + 4)

    encoder_output = jax.random.normal(keys[0], (seq_len, bsz, E), jnp.float32)

    gain = 1.0 / math.sqrt(2.0)
    wk = jnp.stack([_xavier_uniform(keys[1 + i], E, E, gain) for i in range(L)])          # [L,E,E]
    wv = jnp.stack([_xavier_uniform(keys[1 + L + i], E, E, gain) for i in range(L)])      # [L,E,E]
    bbound = 1.0 / math.sqrt(E)   # torch Linear default bias init (untouched by reset_parameters)
    bk = jax.random.uniform(keys[2 * L + 1], (L, E), jnp.float32, -bbound, bbound)
    bv = jax.random.uniform(keys[2 * L + 2], (L, E), jnp.float32, -bbound, bbound)
    sigma = jnp.ones((L, H, 1, D), jnp.float32)               # nn.init.constant_(sigma, 1.0)
    # eval-mode shared random matrices (stored fp16 in the PyTorch module -> quantize then upcast)
    rand_mat = jax.random.normal(keys[2 * L + 3], (H, K, D), jnp.float32)
    rand_mat = rand_mat.astype(jnp.float16).astype(jnp.float32)

    # key_padding_mask: [bsz, src_len], 1s mark padding
    key_padding_mask = jnp.zeros((bsz, seq_len), jnp.bool_).at[1, seq_len - 3:].set(True)

    s, z, built_rm, tau_out = cross_attention_project(
        encoder_output, wk, bk, wv, bv, sigma, rand_mat, key_padding_mask,
        num_heads=H, head_dim=D, proj_dim=K, tau=tau, row_tile=8)   # 2 row tiles: exercises the
    jax.block_until_ready((s, z))                                   # reduction-axis accumulation

    assert s.shape == (L, bsz, H, 2 * K, D) and z.shape == (L, bsz, H, 2 * K)
    assert built_rm.shape == (L, H, K, D)

    # Tight check against a pure-JAX mirror of the kernel math (same fused weights and bf16
    # rounding points): validates indexing / masking / head mapping / z-column plumbing.
    DS = D + 1
    wproj, bproj, wv_aug, bv_aug, _ = _build_fused_params(
        wk, bk, wv, bv, sigma, rand_mat, tau, H=H, D=D, K=K, DS=DS)
    s_m, z_m = _kernel_mirror(encoder_output, wproj, bproj, wv_aug, bv_aug, key_padding_mask,
                              H=H, D=D, K=K, DS=DS)
    assert jnp.allclose(s, s_m, atol=1e-3, rtol=1e-3)
    assert jnp.allclose(z, z_m, atol=1e-3, rtol=1e-3)

    # Loose check against the fp32 PyTorch-semantics reference (bf16 MXU operands introduce
    # ~1e-2-level drift at these magnitudes; structural bugs would be O(1)).
    s_ref, z_ref = _reference(encoder_output, wk, bk, wv, bv, sigma, rand_mat,
                              key_padding_mask, H=H, D=D, K=K, tau=tau)
    assert jnp.allclose(s, s_ref, atol=5e-2, rtol=5e-2)
    assert jnp.allclose(z, z_ref, atol=5e-2, rtol=5e-2)

    print("KERNEL_OK")
</pallas_src>

<mosaic_0001>
module attributes {stable_mosaic.version = 11 : i64} {
  func.func @_cross_attn_project_kernel(%arg0: i32, %arg1: i32, %arg2: i32, %arg3: memref<1x8x32xbf16, #tpu.memory_space<vmem>>, %arg4: memref<1x32x64xbf16, #tpu.memory_space<vmem>>, %arg5: memref<1x1x64xf32, #tpu.memory_space<vmem>>, %arg6: memref<1x32x36xbf16, #tpu.memory_space<vmem>>, %arg7: memref<1x1x36xf32, #tpu.memory_space<vmem>>, %arg8: memref<1x8x1xf32, #tpu.memory_space<vmem>>, %arg9: memref<1x1x32x36xf32, #tpu.memory_space<vmem>>) attributes {dimension_semantics = [#tpu.dimension_semantics<parallel>, #tpu.dimension_semantics<parallel>, #tpu.dimension_semantics<arbitrary>], iteration_bounds = array<i64: 2, 2, 2>, scalar_prefetch = 0 : i64, scratch_operands = 0 : i64, tpu.core_type = #tpu.core_type<tc>, window_params = [{transform_indices = @transform_0, window_bounds = array<i64: 1, 8, 32>}, {pipeline_mode = #tpu.pipeline_mode<synchronous>, transform_indices = @transform_1, window_bounds = array<i64: 1, 32, 64>}, {transform_indices = @transform_2, window_bounds = array<i64: 1, 1, 64>}, {pipeline_mode = #tpu.pipeline_mode<synchronous>, transform_indices = @transform_3, window_bounds = array<i64: 1, 32, 36>}, {transform_indices = @transform_4, window_bounds = array<i64: 1, 1, 36>}, {transform_indices = @transform_5, window_bounds = array<i64: 1, 8, 1>}, {transform_indices = @transform_6, window_bounds = array<i64: 1, 1, 32, 36>}]} {
    %c0_i32 = arith.constant 0 : i32
    %0 = arith.cmpi eq, %arg2, %c0_i32 : i32
    %1 = arith.extui %0 : i1 to i32
    %c0_i32_0 = arith.constant 0 : i32
    %2 = arith.cmpi ne, %1, %c0_i32_0 : i32
    scf.if %2 {
      %cst_31 = arith.constant 0.000000e+00 : f32
      %57 = vector.broadcast %cst_31 : f32 to vector<32x36xf32>
      %c0_32 = arith.constant 0 : index
      %c0_33 = arith.constant 0 : index
      %c0_34 = arith.constant 0 : index
      %c0_35 = arith.constant 0 : index
      %58 = vector.load %arg9[%c0_32, %c0_33, %c0_34, %c0_35] : memref<1x1x32x36xf32, #tpu.memory_space<vmem>>, vector<1x1x32x36xf32>
      %59 = vector.shape_cast %58 : vector<1x1x32x36xf32> to vector<32x36xf32>
      %60 = vector.shape_cast %57 : vector<32x36xf32> to vector<1x1x32x36xf32>
      tpu.vector_store %arg9[%c0_32, %c0_33, %c0_34, %c0_35], %60 {strides = array<i32>} : memref<1x1x32x36xf32, #tpu.memory_space<vmem>>, vector<1x1x32x36xf32>,
    } else {
    }
    %c0 = arith.constant 0 : index
    %c0_1 = arith.constant 0 : index
    %c0_2 = arith.constant 0 : index
    %3 = vector.load %arg3[%c0, %c0_1, %c0_2] : memref<1x8x32xbf16, #tpu.memory_space<vmem>>, vector<1x8x32xbf16>
    %4 = vector.shape_cast %3 : vector<1x8x32xbf16> to vector<8x32xbf16>
    %c0_3 = arith.constant 0 : index
    %c0_4 = arith.constant 0 : index
    %c0_5 = arith.constant 0 : index
    %5 = vector.load %arg4[%c0_3, %c0_4, %c0_5] : memref<1x32x64xbf16, #tpu.memory_space<vmem>>, vector<1x32x64xbf16>
    %6 = vector.shape_cast %5 : vector<1x32x64xbf16> to vector<32x64xbf16>
    %cst = arith.constant dense<0.000000e+00> : vector<8x64xf32>
    %7 = tpu.matmul %4, %6, %cst {dimension_numbers = #tpu.dot_dimension_numbers<[1], [0], [0], [1], [0, 0, 1, 1], [], []>} : vector<8x32xbf16>, vector<32x64xbf16>, vector<8x64xf32> -> vector<8x64xf32>
    %c0_6 = arith.constant 0 : index
    %c0_7 = arith.constant 0 : index
    %c0_8 = arith.constant 0 : index
    %8 = vector.load %arg5[%c0_6, %c0_7, %c0_8] : memref<1x1x64xf32, #tpu.memory_space<vmem>>, vector<1x1x64xf32>
    %9 = vector.shape_cast %8 : vector<1x1x64xf32> to vector<1x64xf32>
    %10 = vector.broadcast %9 : vector<1x64xf32> to vector<8x64xf32>
    %11 = arith.addf %7, %10 : vector<8x64xf32>
    %c0_9 = arith.constant 0 : index
    %c0_10 = arith.constant 0 : index
    %c0_11 = arith.constant 0 : index
    %12 = vector.load %arg6[%c0_9, %c0_10, %c0_11] : memref<1x32x36xbf16, #tpu.memory_space<vmem>>, vector<1x32x36xbf16>
    %13 = vector.shape_cast %12 : vector<1x32x36xbf16> to vector<32x36xbf16>
    %cst_12 = arith.constant dense<0.000000e+00> : vector<8x36xf32>
    %14 = tpu.matmul %4, %13, %cst_12 {dimension_numbers = #tpu.dot_dimension_numbers<[1], [0], [0], [1], [0, 0, 1, 1], [], []>} : vector<8x32xbf16>, vector<32x36xbf16>, vector<8x36xf32> -> vector<8x36xf32>
    %c0_13 = arith.constant 0 : index
    %c0_14 = arith.constant 0 : index
    %c0_15 = arith.constant 0 : index
    %15 = vector.load %arg7[%c0_13, %c0_14, %c0_15] : memref<1x1x36xf32, #tpu.memory_space<vmem>>, vector<1x1x36xf32>
    %16 = vector.shape_cast %15 : vector<1x1x36xf32> to vector<1x36xf32>
    %17 = vector.broadcast %16 : vector<1x36xf32> to vector<8x36xf32>
    %18 = arith.addf %14, %17 : vector<8x36xf32>
    %c0_16 = arith.constant 0 : index
    %c0_17 = arith.constant 0 : index
    %c0_18 = arith.constant 0 : index
    %19 = vector.load %arg8[%c0_16, %c0_17, %c0_18] : memref<1x8x1xf32, #tpu.memory_space<vmem>>, vector<1x8x1xf32>
    %20 = vector.shape_cast %19 : vector<1x8x1xf32> to vector<8x1xf32>
    %21 = math.sin %11 : vector<8x64xf32>
    %22 = vector.broadcast %20 : vector<8x1xf32> to vector<8x64xf32>
    %23 = arith.mulf %21, %22 : vector<8x64xf32>
    %24 = arith.truncf %23 : vector<8x64xf32> to vector<8x64xbf16>
    %25 = math.cos %11 : vector<8x64xf32>
    %26 = vector.broadcast %20 : vector<8x1xf32> to vector<8x64xf32>
    %27 = arith.mulf %25, %26 : vector<8x64xf32>
    %28 = arith.truncf %27 : vector<8x64xf32> to vector<8x64xbf16>
    %29 = arith.truncf %18 : vector<8x36xf32> to vector<8x36xbf16>
    %30 = vector.extract_strided_slice %24 {offsets = [0, 0], sizes = [8, 16], strides = [1, 1]} : vector<8x64xbf16> to vector<8x16xbf16>
    %31 = vector.extract_strided_slice %28 {offsets = [0, 0], sizes = [8, 16], strides = [1, 1]} : vector<8x64xbf16> to vector<8x16xbf16>
    %32 = tpu.concatenate %30, %31 in 1 : vector<8x16xbf16>, vector<8x16xbf16> -> vector<8x32xbf16>
    %33 = vector.extract_strided_slice %29 {offsets = [0, 0], sizes = [8, 9], strides = [1, 1]} : vector<8x36xbf16> to vector<8x9xbf16>
    %cst_19 = arith.constant dense<0.000000e+00> : vector<32x9xf32>
    %34 = tpu.matmul %32, %33, %cst_19 {dimension_numbers = #tpu.dot_dimension_numbers<[0], [0], [1], [1], [0, 1, 1, 1], [], []>} : vector<8x32xbf16>, vector<8x9xbf16>, vector<32x9xf32> -> vector<32x9xf32>
    %35 = vector.extract_strided_slice %24 {offsets = [0, 16], sizes = [8, 16], strides = [1, 1]} : vector<8x64xbf16> to vector<8x16xbf16>
    %36 = vector.extract_strided_slice %28 {offsets = [0, 16], sizes = [8, 16], strides = [1, 1]} : vector<8x64xbf16> to vector<8x16xbf16>
    %37 = tpu.concatenate %35, %36 in 1 : vector<8x16xbf16>, vector<8x16xbf16> -> vector<8x32xbf16>
    %38 = vector.extract_strided_slice %29 {offsets = [0, 9], sizes = [8, 9], strides = [1, 1]} : vector<8x36xbf16> to vector<8x9xbf16>
    %cst_20 = arith.constant dense<0.000000e+00> : vector<32x9xf32>
    %39 = tpu.matmul %37, %38, %cst_20 {dimension_numbers = #tpu.dot_dimension_numbers<[0], [0], [1], [1], [0, 1, 1, 1], [], []>} : vector<8x32xbf16>, vector<8x9xbf16>, vector<32x9xf32> -> vector<32x9xf32>
    %40 = vector.extract_strided_slice %24 {offsets = [0, 32], sizes = [8, 16], strides = [1, 1]} : vector<8x64xbf16> to vector<8x16xbf16>
    %41 = vector.extract_strided_slice %28 {offsets = [0, 32], sizes = [8, 16], strides = [1, 1]} : vector<8x64xbf16> to vector<8x16xbf16>
    %42 = tpu.concatenate %40, %41 in 1 : vector<8x16xbf16>, vector<8x16xbf16> -> vector<8x32xbf16>
    %43 = vector.extract_strided_slice %29 {offsets = [0, 18], sizes = [8, 9], strides = [1, 1]} : vector<8x36xbf16> to vector<8x9xbf16>
    %cst_21 = arith.constant dense<0.000000e+00> : vector<32x9xf32>
    %44 = tpu.matmul %42, %43, %cst_21 {dimension_numbers = #tpu.dot_dimension_numbers<[0], [0], [1], [1], [0, 1, 1, 1], [], []>} : vector<8x32xbf16>, vector<8x9xbf16>, vector<32x9xf32> -> vector<32x9xf32>
    %45 = vector.extract_strided_slice %24 {offsets = [0, 48], sizes = [8, 16], strides = [1, 1]} : vector<8x64xbf16> to vector<8x16xbf16>
    %46 = vector.extract_strided_slice %28 {offsets = [0, 48], sizes = [8, 16], strides = [1, 1]} : vector<8x64xbf16> to vector<8x16xbf16>
    %47 = tpu.concatenate %45, %46 in 1 : vector<8x16xbf16>, vector<8x16xbf16> -> vector<8x32xbf16>
    %48 = vector.extract_strided_slice %29 {offsets = [0, 27], sizes = [8, 9], strides = [1, 1]} : vector<8x36xbf16> to vector<8x9xbf16>
    %cst_22 = arith.constant dense<0.000000e+00> : vector<32x9xf32>
    %49 = tpu.matmul %47, %48, %cst_22 {dimension_numbers = #tpu.dot_dimension_numbers<[0], [0], [1], [1], [0, 1, 1, 1], [], []>} : vector<8x32xbf16>, vector<8x9xbf16>, vector<32x9xf32> -> vector<32x9xf32>
    %c0_23 = arith.constant 0 : index
    %c0_24 = arith.constant 0 : index
    %c0_25 = arith.constant 0 : index
    %c0_26 = arith.constant 0 : index
    %50 = vector.load %arg9[%c0_23, %c0_24, %c0_25, %c0_26] : memref<1x1x32x36xf32, #tpu.memory_space<vmem>>, vector<1x1x32x36xf32>
    %51 = vector.shape_cast %50 : vector<1x1x32x36xf32> to vector<32x36xf32>
    %52 = tpu.concatenate %34, %39, %44, %49 in 1 : vector<32x9xf32>, vector<32x9xf32>, vector<32x9xf32>, vector<32x9xf32> -> vector<32x36xf32>
    %53 = arith.addf %51, %52 : vector<32x36xf32>
    %c0_27 = arith.constant 0 : index
    %c0_28 = arith.constant 0 : index
    %c0_29 = arith.constant 0 : index
    %c0_30 = arith.constant 0 : index
    %54 = vector.load %arg9[%c0_27, %c0_28, %c0_29, %c0_30] : memref<1x1x32x36xf32, #tpu.memory_space<vmem>>, vector<1x1x32x36xf32>
    %55 = vector.shape_cast %54 : vector<1x1x32x36xf32> to vector<32x36xf32>
    %56 = vector.shape_cast %53 : vector<32x36xf32> to vector<1x1x32x36xf32>
    tpu.vector_store %arg9[%c0_27, %c0_28, %c0_29, %c0_30], %56 {strides = array<i32>} : memref<1x1x32x36xf32, #tpu.memory_space<vmem>>, vector<1x1x32x36xf32>,
    return
  }
  func.func @transform_0(%arg0: i32, %arg1: i32, %arg2: i32) -> (i32, i32, i32) {
    %c0_i32 = arith.constant 0 : i32
    %c0_i32_0 = arith.constant 0 : i32
    return %arg1, %arg2, %c0_i32 : i32, i32, i32
  }
  func.func @transform_1(%arg0: i32, %arg1: i32, %arg2: i32) -> (i32, i32, i32) {
    %c0_i32 = arith.constant 0 : i32
    %c0_i32_0 = arith.constant 0 : i32
    %c0_i32_1 = arith.constant 0 : i32
    return %arg0, %c0_i32, %c0_i32_0 : i32, i32, i32
  }
  func.func @transform_2(%arg0: i32, %arg1: i32, %arg2: i32) -> (i32, i32, i32) {
    %c0_i32 = arith.constant 0 : i32
    %c0_i32_0 = arith.constant 0 : i32
    %c0_i32_1 = arith.constant 0 : i32
    return %arg0, %c0_i32, %c0_i32_0 : i32, i32, i32
  }
  func.func @transform_3(%arg0: i32, %arg1: i32, %arg2: i32) -> (i32, i32, i32) {
    %c0_i32 = arith.constant 0 : i32
    %c0_i32_0 = arith.constant 0 : i32
    %c0_i32_1 = arith.constant 0 : i32
    return %arg0, %c0_i32, %c0_i32_0 : i32, i32, i32
  }
  func.func @transform_4(%arg0: i32, %arg1: i32, %arg2: i32) -> (i32, i32, i32) {
    %c0_i32 = arith.constant 0 : i32
    %c0_i32_0 = arith.constant 0 : i32
    %c0_i32_1 = arith.constant 0 : i32
    return %arg0, %c0_i32, %c0_i32_0 : i32, i32, i32
  }
  func.func @transform_5(%arg0: i32, %arg1: i32, %arg2: i32) -> (i32, i32, i32) {
    %c0_i32 = arith.constant 0 : i32
    %c0_i32_0 = arith.constant 0 : i32
    return %arg1, %arg2, %c0_i32 : i32, i32, i32
  }
  func.func @transform_6(%arg0: i32, %arg1: i32, %arg2: i32) -> (i32, i32, i32, i32) {
    %c0_i32 = arith.constant 0 : i32
    %c0_i32_0 = arith.constant 0 : i32
    %c0_i32_1 = arith.constant 0 : i32
    return %arg0, %arg1, %c0_i32, %c0_i32_0 : i32, i32, i32, i32
  }
}

module attributes {stable_mosaic.version = 11 : i64} {
  func.func @_cross_attn_project_kernel(%arg0: i32, %arg1: i32, %arg2: i32, %arg3: memref<1x8x32xbf16, #tpu.memory_space<vmem>>, %arg4: memref<1x32x64xbf16, #tpu.memory_space<vmem>>, %arg5: memref<1x1x64xf32, #tpu.memory_space<vmem>>, %arg6: memref<1x32x36xbf16, #tpu.memory_space<vmem>>, %arg7: memref<1x1x36xf32, #tpu.memory_space<vmem>>, %arg8: memref<1x8x1xf32, #tpu.memory_space<vmem>>, %arg9: memref<1x1x32x36xf32, #tpu.memory_space<vmem>>) attributes {dimension_semantics = [#tpu.dimension_semantics<parallel>, #tpu.dimension_semantics<parallel>, #tpu.dimension_semantics<arbitrary>], iteration_bounds = array<i64: 2, 2, 2>, scalar_prefetch = 0 : i64, scratch_operands = 0 : i64, tpu.core_type = #tpu.core_type<tc>, window_params = [{transform_indices = @transform_0, window_bounds = array<i64: 1, 8, 32>}, {transform_indices = @transform_1, window_bounds = array<i64: 1, 32, 64>}, {transform_indices = @transform_2, window_bounds = array<i64: 1, 1, 64>}, {transform_indices = @transform_3, window_bounds = array<i64: 1, 32, 36>}, {transform_indices = @transform_4, window_bounds = array<i64: 1, 1, 36>}, {transform_indices = @transform_5, window_bounds = array<i64: 1, 8, 1>}, {transform_indices = @transform_6, window_bounds = array<i64: 1, 1, 32, 36>}]} {
    %c0_i32 = arith.constant 0 : i32
    %0 = arith.cmpi eq, %arg2, %c0_i32 : i32
    %1 = arith.extui %0 : i1 to i32
    %c0_i32_0 = arith.constant 0 : i32
    %2 = arith.cmpi ne, %1, %c0_i32_0 : i32
    scf.if %2 {
      %cst_31 = arith.constant 0.000000e+00 : f32
      %57 = vector.broadcast %cst_31 : f32 to vector<32x36xf32>
      %c0_32 = arith.constant 0 : index
      %c0_33 = arith.constant 0 : index
      %c0_34 = arith.constant 0 : index
      %c0_35 = arith.constant 0 : index
      %58 = vector.load %arg9[%c0_32, %c0_33, %c0_34, %c0_35] : memref<1x1x32x36xf32, #tpu.memory_space<vmem>>, vector<1x1x32x36xf32>
      %59 = vector.shape_cast %58 : vector<1x1x32x36xf32> to vector<32x36xf32>
      %60 = vector.shape_cast %57 : vector<32x36xf32> to vector<1x1x32x36xf32>
      tpu.vector_store %arg9[%c0_32, %c0_33, %c0_34, %c0_35], %60 {strides = array<i32>} : memref<1x1x32x36xf32, #tpu.memory_space<vmem>>, vector<1x1x32x36xf32>,
    } else {
    }
    %c0 = arith.constant 0 : index
    %c0_1 = arith.constant 0 : index
    %c0_2 = arith.constant 0 : index
    %3 = vector.load %arg3[%c0, %c0_1, %c0_2] : memref<1x8x32xbf16, #tpu.memory_space<vmem>>, vector<1x8x32xbf16>
    %4 = vector.shape_cast %3 : vector<1x8x32xbf16> to vector<8x32xbf16>
    %c0_3 = arith.constant 0 : index
    %c0_4 = arith.constant 0 : index
    %c0_5 = arith.constant 0 : index
    %5 = vector.load %arg4[%c0_3, %c0_4, %c0_5] : memref<1x32x64xbf16, #tpu.memory_space<vmem>>, vector<1x32x64xbf16>
    %6 = vector.shape_cast %5 : vector<1x32x64xbf16> to vector<32x64xbf16>
    %cst = arith.constant dense<0.000000e+00> : vector<8x64xf32>
    %7 = tpu.matmul %4, %6, %cst {dimension_numbers = #tpu.dot_dimension_numbers<[1], [0], [0], [1], [0, 0, 1, 1], [], []>} : vector<8x32xbf16>, vector<32x64xbf16>, vector<8x64xf32> -> vector<8x64xf32>
    %c0_6 = arith.constant 0 : index
    %c0_7 = arith.constant 0 : index
    %c0_8 = arith.constant 0 : index
    %8 = vector.load %arg5[%c0_6, %c0_7, %c0_8] : memref<1x1x64xf32, #tpu.memory_space<vmem>>, vector<1x1x64xf32>
    %9 = vector.shape_cast %8 : vector<1x1x64xf32> to vector<1x64xf32>
    %10 = vector.broadcast %9 : vector<1x64xf32> to vector<8x64xf32>
    %11 = arith.addf %7, %10 : vector<8x64xf32>
    %c0_9 = arith.constant 0 : index
    %c0_10 = arith.constant 0 : index
    %c0_11 = arith.constant 0 : index
    %12 = vector.load %arg6[%c0_9, %c0_10, %c0_11] : memref<1x32x36xbf16, #tpu.memory_space<vmem>>, vector<1x32x36xbf16>
    %13 = vector.shape_cast %12 : vector<1x32x36xbf16> to vector<32x36xbf16>
    %cst_12 = arith.constant dense<0.000000e+00> : vector<8x36xf32>
    %14 = tpu.matmul %4, %13, %cst_12 {dimension_numbers = #tpu.dot_dimension_numbers<[1], [0], [0], [1], [0, 0, 1, 1], [], []>} : vector<8x32xbf16>, vector<32x36xbf16>, vector<8x36xf32> -> vector<8x36xf32>
    %c0_13 = arith.constant 0 : index
    %c0_14 = arith.constant 0 : index
    %c0_15 = arith.constant 0 : index
    %15 = vector.load %arg7[%c0_13, %c0_14, %c0_15] : memref<1x1x36xf32, #tpu.memory_space<vmem>>, vector<1x1x36xf32>
    %16 = vector.shape_cast %15 : vector<1x1x36xf32> to vector<1x36xf32>
    %17 = vector.broadcast %16 : vector<1x36xf32> to vector<8x36xf32>
    %18 = arith.addf %14, %17 : vector<8x36xf32>
    %c0_16 = arith.constant 0 : index
    %c0_17 = arith.constant 0 : index
    %c0_18 = arith.constant 0 : index
    %19 = vector.load %arg8[%c0_16, %c0_17, %c0_18] : memref<1x8x1xf32, #tpu.memory_space<vmem>>, vector<1x8x1xf32>
    %20 = vector.shape_cast %19 : vector<1x8x1xf32> to vector<8x1xf32>
    %21 = math.sin %11 : vector<8x64xf32>
    %22 = vector.broadcast %20 : vector<8x1xf32> to vector<8x64xf32>
    %23 = arith.mulf %21, %22 : vector<8x64xf32>
    %24 = arith.truncf %23 : vector<8x64xf32> to vector<8x64xbf16>
    %25 = math.cos %11 : vector<8x64xf32>
    %26 = vector.broadcast %20 : vector<8x1xf32> to vector<8x64xf32>
    %27 = arith.mulf %25, %26 : vector<8x64xf32>
    %28 = arith.truncf %27 : vector<8x64xf32> to vector<8x64xbf16>
    %29 = arith.truncf %18 : vector<8x36xf32> to vector<8x36xbf16>
    %30 = vector.extract_strided_slice %24 {offsets = [0, 0], sizes = [8, 16], strides = [1, 1]} : vector<8x64xbf16> to vector<8x16xbf16>
    %31 = vector.extract_strided_slice %28 {offsets = [0, 0], sizes = [8, 16], strides = [1, 1]} : vector<8x64xbf16> to vector<8x16xbf16>
    %32 = tpu.concatenate %30, %31 in 1 : vector<8x16xbf16>, vector<8x16xbf16> -> vector<8x32xbf16>
    %33 = vector.extract_strided_slice %29 {offsets = [0, 0], sizes = [8, 9], strides = [1, 1]} : vector<8x36xbf16> to vector<8x9xbf16>
    %cst_19 = arith.constant dense<0.000000e+00> : vector<32x9xf32>
    %34 = tpu.matmul %32, %33, %cst_19 {dimension_numbers = #tpu.dot_dimension_numbers<[0], [0], [1], [1], [0, 1, 1, 1], [], []>} : vector<8x32xbf16>, vector<8x9xbf16>, vector<32x9xf32> -> vector<32x9xf32>
    %35 = vector.extract_strided_slice %24 {offsets = [0, 16], sizes = [8, 16], strides = [1, 1]} : vector<8x64xbf16> to vector<8x16xbf16>
    %36 = vector.extract_strided_slice %28 {offsets = [0, 16], sizes = [8, 16], strides = [1, 1]} : vector<8x64xbf16> to vector<8x16xbf16>
    %37 = tpu.concatenate %35, %36 in 1 : vector<8x16xbf16>, vector<8x16xbf16> -> vector<8x32xbf16>
    %38 = vector.extract_strided_slice %29 {offsets = [0, 9], sizes = [8, 9], strides = [1, 1]} : vector<8x36xbf16> to vector<8x9xbf16>
    %cst_20 = arith.constant dense<0.000000e+00> : vector<32x9xf32>
    %39 = tpu.matmul %37, %38, %cst_20 {dimension_numbers = #tpu.dot_dimension_numbers<[0], [0], [1], [1], [0, 1, 1, 1], [], []>} : vector<8x32xbf16>, vector<8x9xbf16>, vector<32x9xf32> -> vector<32x9xf32>
    %40 = vector.extract_strided_slice %24 {offsets = [0, 32], sizes = [8, 16], strides = [1, 1]} : vector<8x64xbf16> to vector<8x16xbf16>
    %41 = vector.extract_strided_slice %28 {offsets = [0, 32], sizes = [8, 16], strides = [1, 1]} : vector<8x64xbf16> to vector<8x16xbf16>
    %42 = tpu.concatenate %40, %41 in 1 : vector<8x16xbf16>, vector<8x16xbf16> -> vector<8x32xbf16>
    %43 = vector.extract_strided_slice %29 {offsets = [0, 18], sizes = [8, 9], strides = [1, 1]} : vector<8x36xbf16> to vector<8x9xbf16>
    %cst_21 = arith.constant dense<0.000000e+00> : vector<32x9xf32>
    %44 = tpu.matmul %42, %43, %cst_21 {dimension_numbers = #tpu.dot_dimension_numbers<[0], [0], [1], [1], [0, 1, 1, 1], [], []>} : vector<8x32xbf16>, vector<8x9xbf16>, vector<32x9xf32> -> vector<32x9xf32>
    %45 = vector.extract_strided_slice %24 {offsets = [0, 48], sizes = [8, 16], strides = [1, 1]} : vector<8x64xbf16> to vector<8x16xbf16>
    %46 = vector.extract_strided_slice %28 {offsets = [0, 48], sizes = [8, 16], strides = [1, 1]} : vector<8x64xbf16> to vector<8x16xbf16>
    %47 = tpu.concatenate %45, %46 in 1 : vector<8x16xbf16>, vector<8x16xbf16> -> vector<8x32xbf16>
    %48 = vector.extract_strided_slice %29 {offsets = [0, 27], sizes = [8, 9], strides = [1, 1]} : vector<8x36xbf16> to vector<8x9xbf16>
    %cst_22 = arith.constant dense<0.000000e+00> : vector<32x9xf32>
    %49 = tpu.matmul %47, %48, %cst_22 {dimension_numbers = #tpu.dot_dimension_numbers<[0], [0], [1], [1], [0, 1, 1, 1], [], []>} : vector<8x32xbf16>, vector<8x9xbf16>, vector<32x9xf32> -> vector<32x9xf32>
    %c0_23 = arith.constant 0 : index
    %c0_24 = arith.constant 0 : index
    %c0_25 = arith.constant 0 : index
    %c0_26 = arith.constant 0 : index
    %50 = vector.load %arg9[%c0_23, %c0_24, %c0_25, %c0_26] : memref<1x1x32x36xf32, #tpu.memory_space<vmem>>, vector<1x1x32x36xf32>
    %51 = vector.shape_cast %50 : vector<1x1x32x36xf32> to vector<32x36xf32>
    %52 = tpu.concatenate %34, %39, %44, %49 in 1 : vector<32x9xf32>, vector<32x9xf32>, vector<32x9xf32>, vector<32x9xf32> -> vector<32x36xf32>
    %53 = arith.addf %51, %52 : vector<32x36xf32>
    %c0_27 = arith.constant 0 : index
    %c0_28 = arith.constant 0 : index
    %c0_29 = arith.constant 0 : index
    %c0_30 = arith.constant 0 : index
    %54 = vector.load %arg9[%c0_27, %c0_28, %c0_29, %c0_30] : memref<1x1x32x36xf32, #tpu.memory_space<vmem>>, vector<1x1x32x36xf32>
    %55 = vector.shape_cast %54 : vector<1x1x32x36xf32> to vector<32x36xf32>
    %56 = vector.shape_cast %53 : vector<32x36xf32> to vector<1x1x32x36xf32>
    tpu.vector_store %arg9[%c0_27, %c0_28, %c0_29, %c0_30], %56 {strides = array<i32>} : memref<1x1x32x36xf32, #tpu.memory_space<vmem>>, vector<1x1x32x36xf32>,
    return
  }
  func.func @transform_0(%arg0: i32, %arg1: i32, %arg2: i32) -> (i32, i32, i32) {
    %c0_i32 = arith.constant 0 : i32
    %c0_i32_0 = arith.constant 0 : i32
    return %arg1, %arg2, %c0_i32 : i32, i32, i32
  }
  func.func @transform_1(%arg0: i32, %arg1: i32, %arg2: i32) -> (i32, i32, i32) {
    %c0_i32 = arith.constant 0 : i32
    %c0_i32_0 = arith.constant 0 : i32
    %c0_i32_1 = arith.constant 0 : i32
    return %arg0, %c0_i32, %c0_i32_0 : i32, i32, i32
  }
  func.func @transform_2(%arg0: i32, %arg1: i32, %arg2: i32) -> (i32, i32, i32) {
    %c0_i32 = arith.constant 0 : i32
    %c0_i32_0 = arith.constant 0 : i32
    %c0_i32_1 = arith.constant 0 : i32
    return %arg0, %c0_i32, %c0_i32_0 : i32, i32, i32
  }
  func.func @transform_3(%arg0: i32, %arg1: i32, %arg2: i32) -> (i32, i32, i32) {
    %c0_i32 = arith.constant 0 : i32
    %c0_i32_0 = arith.constant 0 : i32
    %c0_i32_1 = arith.constant 0 : i32
    return %arg0, %c0_i32, %c0_i32_0 : i32, i32, i32
  }
  func.func @transform_4(%arg0: i32, %arg1: i32, %arg2: i32) -> (i32, i32, i32) {
    %c0_i32 = arith.constant 0 : i32
    %c0_i32_0 = arith.constant 0 : i32
    %c0_i32_1 = arith.constant 0 : i32
    return %arg0, %c0_i32, %c0_i32_0 : i32, i32, i32
  }
  func.func @transform_5(%arg0: i32, %arg1: i32, %arg2: i32) -> (i32, i32, i32) {
    %c0_i32 = arith.constant 0 : i32
    %c0_i32_0 = arith.constant 0 : i32
    return %arg1, %arg2, %c0_i32 : i32, i32, i32
  }
  func.func @transform_6(%arg0: i32, %arg1: i32, %arg2: i32) -> (i32, i32, i32, i32) {
    %c0_i32 = arith.constant 0 : i32
    %c0_i32_0 = arith.constant 0 : i32
    %c0_i32_1 = arith.constant 0 : i32
    return %arg0, %arg1, %c0_i32, %c0_i32_0 : i32, i32, i32, i32
  }
}

</mosaic_0001>

<bundles_post_ra>
// kernel: tpu_custom_call.1
= control target key start
LH: loop header
LB: loop body
LE: loop exit
PB: predicated region body
PF: predicated region fallthrough
CT: control target
= control target key end

     0   :  { %s2333_s0 = inlined_call_operand.hbm [shape: bf16[2,16,32], index: 0, kind: input, shape index: {}]   ;;  %s2334_s1 = inlined_call_operand.vmem [shape: bf16[2,32,64], index: 1, kind: input, shape index: {}]   ;;  %s2335_s2 = inlined_call_operand.vmem [shape: f32[2,1,64], index: 2, kind: input, shape index: {}]   ;;  %s2336_s3 = inlined_call_operand.hbm [shape: bf16[2,32,36], index: 3, kind: input, shape index: {}]   ;;  %s2337_s4 = inlined_call_operand.hbm [shape: f32[2,1,36], index: 4, kind: input, shape index: {}]   ;;  %s2338_s5 = inlined_call_operand.vmem [shape: f32[2,16,1], index: 5, kind: input, shape index: {}]   ;;  %s2339_s6 = inlined_call_operand.hbm [shape: f32[2,2,32,36], index: 6, kind: output, shape index: {}]  }
   0x1   :  { %2361 = sst [smem:[#allocation28_spill]] %s2333_s0 }
   0x2   :  { %2362 = sst [smem:[#allocation29_spill]] %s2334_s1 }
   0x3   :  { %2363 = sst [smem:[#allocation30_spill]] %s2335_s2 }
   0x4   :  { %2364 = sst [smem:[#allocation31_spill]] %s2336_s3 }
   0x5   :  { %2365 = sst [smem:[#allocation32_spill]] %s2337_s4 }
   0x6   :  { %2366 = sst [smem:[#allocation33_spill]] %s2338_s5 }
   0x7   :  { %2367 = sst [smem:[#allocation34_spill]] %s2339_s6 }
   0x8   :  { %11 = vsyncpa [#allocation3], 0 }
   0x9   :  { %13 = vsyncpa [#allocation3 + $0x1], 0 }
   0xa   :  { %14 = vsyncpa [#allocation6], 0 }
   0xb   :  { %15 = vsyncpa [#allocation4], 0 }
   0xc   :  { %17 = vsyncpa [#allocation4 + $0x1], 0  ;;  %s1870_s21 = smov 0   ;;  %s1872_s22 = smov 0  }
   0xd   :  { %s1874_s23 = smov 0   ;;  %s1876_s24 = smov 0  }
   0xe   :  { %s1878_s25 = smov 0   ;;  %s1880_s26 = smov 0  }
   0xf   :  { %s1882_s27 = smov 0   ;;  %s1884_s28 = smov 0  }
  0x10   :  { %s1886_s29 = smov 0   ;;  %s1888_s30 = smov 0  }
  0x11   :  { %s1890_s7 = smov 0   ;;  %s1892_s8 = smov 0  }
  0x12   :  { %s1894_s9 = smov 0   ;;  %s1896_s10 = smov 0  }
  0x13   :  { %s1898_s11 = smov 0   ;;  %s1900_s12 = smov 0  }
  0x14 LB: > { %2368 = sst [smem:[#allocation13_spill]] %s1750_s21  ;;  %s1949_s13 = sadd.s32 4294967295, %s1810_s12   ;;  %s1810_s12 = sphi %s1900_s12, %s23_s12   ;;  %s1806_s11 = sphi %s1898_s11, %s2424_s11   ;;  %s1802_s10 = sphi %s1896_s10, %s2423_s10   ;;  %s1798_s9 = sphi %s1894_s9, %s2422_s9   ;;  %s1794_s8 = sphi %s1892_s8, %s2421_s8   ;;  %s1790_s7 = sphi %s1890_s7, %s2420_s7   ;;  %s1786_s30 = sphi %s1888_s30, %s2419_s30   ;;  %s1782_s29 = sphi %s1886_s29, %s2418_s29   ;;  %s1778_s28 = sphi %s1884_s28, %s2417_s28   ;;  %s1774_s27 = sphi %s1882_s27, %s2416_s27   ;;  %s1770_s26 = sphi %s1880_s26, %s2429_s26   ;;  %s1766_s25 = sphi %s1878_s25, %s2428_s25   ;;  %s1762_s24 = sphi %s1876_s24, %s2427_s24   ;;  %s1758_s23 = sphi %s1874_s23, %s2426_s23   ;;  %s1754_s22 = sphi %s1872_s22, %s2425_s22   ;;  %s1750_s21 = sphi %s1870_s21, %s2414_s21  }
  0x15   : > { %2369 = sst [smem:[#allocation14_spill]] %s1754_s22  ;;  %s1299_s14 = sadd.s32 4294967294, %s1810_s12  }
  0x16   : > { %2370 = sst [smem:[#allocation15_spill]] %s1778_s28  ;;  %s35_s15 = sadd.s32 1, %s1798_s9 }
  0x17   : > { %2371 = sst [smem:[#allocation16_spill]] %s1782_s29  ;;  %s38_s16 = sadd.s32 1, %s1802_s10 }
  0x18   : > { %2372 = sst [smem:[#allocation17_spill]] %s1786_s30  ;;  %p36_p0 = scmp.ge.s32.totalorder %s35_s15, 2 }
  0x19   : > { %2373 = sst [smem:[#allocation18_spill]] %s1790_s7  ;;  %s51_s17 = sadd.s32 1, %s1782_s29 }
  0x1a   : > { %2374 = sst [smem:[#allocation19_spill]] %s1798_s9  ;;  %p58_p1 = scmp.ne.s32.totalorder %s1782_s29, %s1778_s28 }
  0x1b   : > { %2375 = sst [smem:[#allocation20_spill]] %s1802_s10  ;;  %p2353_p2 = scmp.eq.s32.totalorder %s1810_s12, 0 }
  0x1c   : > { %2376 = sst [smem:[#allocation21_spill]] %s1806_s11  ;;  %s2431_s15 = smov (%p36_p0, %s35_s15), 0 }
  0x1d   : > { %2377 = sst [smem:[#allocation22_spill]] %s2431_s15  ;;  %s2433_s16 = smov (!%p36_p0, %s38_s16), %s1802_s10 }
  0x1e   : > { %s47_s18 = ssub.s32 %s1798_s9, %s2431_s15  ;;  %p1967_p3 = por %p2353_p2, %p58_p1 }
  0x1f   : > { %p2354_p4 = scmp.ge.s32.totalorder %s2433_s16, 2  ;;  %p64_p5 = scmp.ne.s32.totalorder %s1778_s28, %s1774_s27 }
  0x20   : > { %p65_p6 = scmp.eq.s32.totalorder %s1949_s13, 0  ;;  %p221_p7 = scmp.ne.s32.totalorder %s1758_s23, %s1754_s22 }
  0x21   : > { %s1979_s20 = scalar_select %p2354_p4, 0, %s2433_s16  }
  0x22   : > { %p1983_p8 = por %p65_p6, %p64_p5  ;;  %p222_p9 = scmp.eq.s32.totalorder %s1949_s13, 7 }
  0x23   : > { %2379 = sst [smem:[#allocation23_spill]] %s1979_s20  ;;  %s1990_s6 = ssub.s32 %s1802_s10, %s1979_s20 }
  0x24   : > { %p227_p10 = scmp.ne.s32.totalorder %s1754_s22, %s1750_s21  ;;  %s48_s27 = sor.u32 %s47_s18, %s1990_s6 }
  0x25   : > { %p1995_p11 = por %p222_p9, %p221_p7  ;;  %p49_p12 = scmp.eq.s32.totalorder %s48_s27, 0 }
  0x26   : > { %p228_p13 = scmp.eq.s32.totalorder %s1299_s14, 7  ;;  %p2352_p0 = scmp.lt.s32.totalorder %s1810_s12, 8 }
  0x27   : > { %s2381_s5 = scalar_select %p1995_p11, 1, 0 }
  0x28   : > { %s2001_s1 = scalar_select %p49_p12, %s1782_s29, %s51_s17  }
  0x29   : > { %2382 = sst [smem:[#allocation24_spill]] %s2381_s5  ;;  %p2003_p1 = por %p228_p13, %p227_p10 }
  0x2a   : > { %2383 = sst [smem:[#allocation25_spill]] %s2001_s1  ;;  %s273_s20 = sand.u32 1, %s1810_s12  }
  0x2b   : > { %s2384_s2 = scalar_select %p2003_p1, 1, 0 }
  0x2c   : > { %s275_s18 = sand.u32 1, %s1782_s29   ;;  %s1305_s5 = sshll.u32 %s1802_s10, 1 }
  0x2d   : > { %2385 = sst [smem:[#allocation26_spill]] %s2384_s2  ;;  %s1304_s21 = sshll.u32 %s275_s18, 2 }
  0x2e   : > { %s281_s27 = sadd.s32 %s1798_s9, %s1305_s5  ;;  %s277_s14 = scalar_lea.vmem [#allocation2], %s1304_s21 }
  0x2f   : > { %s1306_s30 = sshll.u32 %s281_s27, 2  ;;  %s287_s7 = sshll.u32 %s277_s14, 4  ;;  %s288_s7 = int_to_ptr.vmem [resolvable:$true] %s287_s7 }
  0x30   : > { %s2386_s0 = sld [smem:[#allocation28_spill]]  ;;  %p1374_p5 = pnand %p2352_p0, %p1967_p3 }
  0x31   : > { %s2018_s29 = scalar_lea.sflag [#allocation3], %s273_s20  ;;  %p142_p7 = scmp.ne.s32.totalorder %s1766_s25, %s1762_s24 }
  0x32   : > { %p1300_p9 = scmp.ge.s32.totalorder %s1810_s12, 1  ;;  %p235_p10 = scmp.lt.s32.totalorder %s1810_s12, 9 }
  0x33   : > { %s1353_s5 = sshll.u32 %s1794_s8, 4  ;;  %p2028_p12 = por %p142_p7, %p65_p6 }
  0x34   : > { %s2388_s3 = sld [smem:[#allocation31_spill]]  ;;  %p2035_p3 = pnand %p1300_p9, %p235_p10 }
  0x35   : > { %s1812_s24 = smov [#allocation5]  }
  0x36   : > { %s283_s22 = scalar_lea.hbm %s2386_s0, %s1306_s30  ;;  %p1369_p13 = pneg %p2035_p3 }
  0x37   : > { %s285_s2 = sshll.u32 %s283_s22, 4  ;;  %s286_s2 = int_to_ptr.hbm [resolvable:$true] %s285_s2 }
  0x38   : > { %1376 = dma.hbm_to_vmem [thread:$0]  (!%p1374_p5), %s286_s2, 64, %s288_s7, %s2018_s29  }
  0x39   : > { %s259_s7 = sshll.u32 %s1812_s24, 4  ;;  %p2043_p6 = pnand %p1369_p13, %p2028_p12  ;;  %s260_s7 = int_to_ptr.vmem [resolvable:$true] %s259_s7 }
  0x3a   : > { %s256_s22 = scalar_lea.hbm %s2388_s3, %s1353_s5  ;;  %s1587_s5 = scalar_lea.hbm %s2388_s3, 32 }
  0x3b   : > { %s257_s2 = sshll.u32 %s256_s22, 4  ;;  %p1584_p7 = pneg %p2043_p6  ;;  %s258_s2 = int_to_ptr.hbm [resolvable:$true] %s257_s2 }
  0x3c   : > { %s1580_s18 = sshra.s32 %s258_s2, 4  ;;  %s1581_s18 = int_to_ptr.hbm [resolvable:$true] %s1580_s18 }
  0x3d   : > { %s1582_s27 = scalar_lea.hbm %s1581_s18, 16  ;;  %p1588_p13 = scmp.lt.s32.totalorder %s1581_s18, %s2388_s3 }
  0x3e   : > { %p1583_p5 = scmp.ne.s32.totalorder %s1581_s18, %s1582_s27  ;;  %p1589_p0 = scmp.lt.s32.totalorder %s1587_s5, %s1582_s27 }
  0x40   : > { %p1585_p9 = pnand %p1584_p7, %p1583_p5  ;;  %p1590_p2 = por %p1589_p0, %p1588_p13 }
  0x42   : > { %p1586_p10 = pneg %p1585_p9 }
  0x44   : > { %p1591_p4 = pnand %p1590_p2, %p1586_p10 }
  0x46   : > { %1594 = shalt.err (!%p1591_p4)
}
  0x47   : > { %s1813_s22 = smov 64   ;;  %s1814_s24 = smov 4  }
  0x48   : > { %1372 = dma.hbm_to_vmem [thread:$0]  (!%p2043_p6), %s258_s2, 256, %s260_s7, [#allocation6], %s1813_s22, %s1813_s22, %s1814_s24  }
  0x49   : > { %s42_s18 = sadd.s32 1, %s1806_s11  ;;  %p2391_p2 = scmp.ge.s32.totalorder %s2433_s16, 2 }
  0x4a   : > { %s129_s27 = sadd.s32 1, %s1770_s26  ;;  %p162_p4 = scmp.ne.s32.totalorder %s1770_s26, %s1766_s25 }
  0x4b   : > { %s2435_s18 = smov (!%p2391_p2, %s42_s18), %s1806_s11  ;;  %s211_s14 = sadd.s32 1, %s1758_s23 }
  0x4c   : > { %p44_p0 = scmp.ge.s32.totalorder %s2435_s18, 2  ;;  %p2392_p5 = scmp.eq.s32.totalorder %s1810_s12, 0 }
  0x4d   : > { %s302_s5 = sand.u32 1, %s1770_s26   ;;  %s2395_s4 = sld [smem:[#allocation32_spill]] }
  0x4e   : > { %p2067_p7 = por %p162_p4, %p2392_p5  ;;  %s2437_s18 = smov (%p44_p0, %s2435_s18), 0 }
  0x4f   : > { %2394 = sst [smem:[#allocation27_spill]] %s2437_s18  ;;  %s126_s20 = ssub.s32 %s1806_s11, %s2437_s18 }
  0x50   : > { %p127_p6 = scmp.eq.s32.totalorder %s126_s20, 0  ;;  %s208_s30 = sor.u32 %s126_s20, %s1990_s6 }
  0x51   : > { %p209_p9 = scmp.eq.s32.totalorder %s208_s30, 0  ;;  %s303_s0 = scalar_lea.vmem [#allocation7], %s302_s5 }
  0x52   : > { %s2082_s22 = scalar_select %p127_p6, %s1770_s26, %s129_s27  }
  0x53   : > { %s306_s7 = scalar_lea.hbm %s2395_s4, %s1806_s11  ;;  %s310_s3 = sshll.u32 %s303_s0, 4  ;;  %s311_s3 = int_to_ptr.vmem [resolvable:$true] %s310_s3 }
  0x54   : > { %s308_s1 = sshll.u32 %s306_s7, 4  ;;  %p2396_p10 = scmp.lt.s32.totalorder %s1810_s12, 8  ;;  %s309_s1 = int_to_ptr.hbm [resolvable:$true] %s308_s1 }
  0x55   : > { %s2085_s24 = scalar_select %p209_p9, %s1758_s23, %s211_s14  }
  0x56   : > { %p1377_p13 = pnand %p2396_p10, %p2067_p7  ;;  %330 = sbr.rel (%p2035_p3) target bundleno = 984 (0x3d8), region = 44 }
  0x57   : > { %s332_s6 = sand.u32 (!%p2035_p3), 1, %s1949_s13   ;;  %s334_s2 = sand.u32 (!%p2035_p3), 1, %s1778_s28  }
  0x58   : > { %1379 = dma.hbm_to_vmem [thread:$0]  (!%p1377_p13), %s309_s1, 16, %s311_s3, %s2018_s29  }
  0x59   : > { %s2096_s16 = sshll.u32 (!%p2035_p3), %s334_s2, 2  ;;  %s333_s27 = scalar_lea.sflag (!%p2035_p3), [#allocation3], %s332_s6 }
  0x5b   : > { %1733 = dma.done.wait (%p1983_p8), %s333_s27, 64  }
  0x5c   : > { %1735 = vsyncadd (%p1983_p8), %s333_s27, 4294967232 }
  0x5d   : > { %1737 = dma.done.wait (%p2028_p12), [#allocation6], 256  }
  0x5e   : > { %1739 = vsyncadd (%p2028_p12), [#allocation6], 4294967040  ;;  %s349_s0 = sand.u32 1, %s1766_s25  }
  0x5f   : > { %s2108_s3 = scalar_lea.vmem [#allocation7], %s349_s0 }
  0x60   : > { %1741 = dma.done.wait (%p2028_p12), %s333_s27, 16  }
  0x61   : > { %1743 = vsyncadd (%p2028_p12), %s333_s27, 4294967280  ;;  %s2397_s29 = sld [smem:[#allocation14_spill]]  ;;  %p400_p8 = scmp.lt.s32.totalorder %s1794_s8, 1 }
  0x62   : > { %s2398_s13 = sld [smem:[#allocation18_spill]] }
  0x63   : > { %s2399_s15 = sld [smem:[#allocation17_spill]] }
  0x64   : > { %s2121_s5 = scalar_select %p400_p8, %s1794_s8, 1 }
  0x65   : > { %s2400_s1 = sld [smem:[#allocation30_spill]] }
  0x66   : > { %s1354_s21 = sshll.u32 %s2121_s5, 4  ;;  %s2401_s27 = sld [smem:[#allocation29_spill]] }
  0x67   : > { %s2355_s19 = sand.u32 1, %s2397_s29   ;;  %s2402_s10 = sld [smem:[#allocation33_spill]] }
  0x68   : > { %s1309_s17 = sshll.u32 %s2355_s19, 5  ;;  %p408_p3 = scmp.lt.s32.totalorder %s2398_s13, 1 }
  0x69   : > { %p410_p2 = scmp.lt.s32.totalorder %s2399_s15, 1  ;;  %s2136_s28 = scalar_lea.vmem [#allocation8], %s1309_s17 }
  0x6a   : > { %s2439_s13 = smov (!%p408_p3, %s2398_s13), 1  ;;  %p1314_p12 = scmp.ne.s32.totalorder %s2399_s15, 0 }
  0x6b   : > { %s407_s30 = scalar_lea.vmem %s2400_s1, %s2121_s5  ;;  %s1312_s14 = sshll.u32 %s2439_s13, 1 }
  0x6c   : > { %s404_s0 = scalar_lea.vmem %s2401_s27, %s1354_s21 }
  0x6d   : > { %s411_s4 = scalar_select %p410_p2, %s2399_s15, 1 }
  0x6e   : > { %420 = sbr.rel (%p1314_p12) target bundleno = 120 (0x78), region = 60 }
  0x6f   : > { %s413_s29 = sadd.s32 %s1312_s14, %s411_s4 }
  0x70   : > { %s1313_s19 = sshll.u32 %s413_s29, 3 }
  0x71   : > { %s415_s9 = scalar_lea.vmem %s2402_s10, %s1313_s19 }
  0x73   : > { %vm421_vm0 = vcmask 293888   ;;  %v1815_v0 = vmov 0.0  }
  0x74   : > { %422 = vst.msk [vmem:[%s2136_s28] sm:$0xff] %vm421_vm0, %v1815_v0 }
  0x75   : > { %423 = vst.msk [vmem:[%s2136_s28 + $0x8] sm:$0xff] %vm421_vm0, %v1815_v0 }
  0x76   : > { %424 = vst.msk [vmem:[%s2136_s28 + $0x10] sm:$0xff] %vm421_vm0, %v1815_v0 }
  0x77   : > { %425 = vst.msk [vmem:[%s2136_s28 + $0x18] sm:$0xff] %vm421_vm0, %v1815_v0 }
  0x78 PF: > { %v1356_v1 = vld [vmem:[%s404_s0 + $0x8] sm:$0xff]  ;;  %v1358_v2 = vld [vmem:[#allocation5 + $0x8] sm:$0xff]  ;;  %v1816_v3 = vmov 0   ;;  %v497_v4 = vld [vmem:[%s415_s9] sm:$0xff]  ;;  %s2403_s4 = scalar_lea.vmem [#allocation2], %s2096_s16  ;;  %vm447_vm1 = vcmask 261120  }
  0x79   : > { %1537 = vset.pattern.permute.xlu0 %v1816_v3  ;;  %457 = vmatpush.bf16.msra.mxu0 %v1356_v1  ;;  %v1355_v5 = vld [vmem:[%s404_s0] sm:$0xff]  ;;  %v1357_v6 = vld [vmem:[#allocation5] sm:$0xff]  ;;  %s1817_s9 = smov 119   ;;  %v1818_v30 = vmov 683565275   ;;  %vm850_vm0 = vcmask 1043456  }
  0x7a   : > { %655 = vperm.xlu0 %1537, %v497_v4   ;;  %490 = vmatpush.bf16.msra.mxu1 %v1358_v2  ;;  %v426_v7 = vld [vmem:[%s2403_s4] sm:$0xf]  ;;  %v1819_v32 = vmov 2475754826   ;;  %v1820_v35 = vmov 2131351028  }
  0x7b   : > { %v1548_v8 = vld [vmem:[%s407_s30] ss:$0 sm:$0xff]  ;;  %v1821_v38 = vmov 2102212464   ;;  %v1822_v41 = vmov 920167782  }
  0x7c   : > { %v1549_v11 = vld [vmem:[%s2108_s3] ss:$0 sm:$0xff]  ;;  %v1823_v44 = vmov 1326507024   ;;  %s1824_s16 = smov 16   ;;  %s1825_s14 = smov 96  }
  0x7d   : > { %458 = vmatpush.bf16.msra.mxu0 %v1355_v5  ;;  %s1826_s3 = smov 112   ;;  %s1827_s13 = smov 80  }
  0x7e   : > { %491 = vmatpush.bf16.msra.mxu1 %v1357_v6  ;;  %s1828_s15 = smov 110   ;;  %s1829_s19 = smov 101  }
  0x7f   : > { %s1830_s17 = smov 18   ;;  %s1831_s5 = smov 9  }
  0x80   : > { %1323 = vmatmul.msk.bf16.vlgmr.msra.gmra.mxu0 %vm447_vm1, %v426_v7  ;;  %s1832_s21 = smov 27   ;;  %s2405_s7 = sld [smem:[#allocation18_spill]] }
  0x81   : > { %1332 = vmatmul.msk.bf16.vlgmr.msra.gmra.mxu1 %vm447_vm1, %v426_v7  ;;  %s1349_s1 = sshll.u32 %s1794_s8, 3  ;;  %s2406_s6 = sld [smem:[#allocation14_spill]] }
  0x82   : > { %s2407_s29 = sld [smem:[#allocation34_spill]]  ;;  %s1130_s11 = sshll.u32 %s2136_s28, 4  ;;  %s1131_s11 = int_to_ptr.vmem [resolvable:$true] %s1130_s11 }
  0x86   : > { %s1348_s20 = sshll.u32 %s2405_s7, 2 }
  0x87   : > { %s1127_s30 = sadd.s32 %s1349_s1, %s1348_s20  ;;  %s2410_s8 = sand.u32 1, %s2406_s6  }
  0x88   : > { %s1350_s2 = sshll.u32 %s1127_s30, 3  ;;  %s2408_s4 = smov %s2407_s29 }
  0x89   : > { %s1129_s10 = scalar_lea.hbm %s2407_s29, %s1350_s2 }
  0xfd   : > { %v460_v9 = vpop.f32.mrf.mxu0 }
  0xfe   : > { %v2151_v10 = vadd.f32 %v1548_v8, %v460_v9  ;;  %v493_v12 = vpop.f32.mrf.mxu1 }
  0xff   : > { %v494_v14 = vadd.f32 %v1549_v11, %v493_v12 }
 0x100   : > { %v501_v13 = vand.u32 2139095040, %v2151_v10  ;;  %v498_v19 = vand.u32 2147483647, %v2151_v10  ;;  %vm500_vm14 = vcmp.lt.s32.totalorder %v2151_v10, 0 }
 0x101   : > { %v2155_v16 = vpack.c.bf16 %v494_v14, %v494_v14 }
 0x102   : > { %v502_v15 = vshrl.u32 %v501_v13, 23  ;;  %v505_v24 = vand.u32 8388607, %v498_v19  ;;  %vm499_vm15 = vcmp.le.f32.partialorder %v498_v19, 0.7853982 }
 0x103   : > { %v899_v18 = vunpack.c.l.b16 %v2155_v16 }
 0x104   : > { %v1333_v17 = vadd.s32 4294967169, %v502_v15  ;;  %v506_v28 = vor.u32 8388608, %v505_v24 }
 0x105   : > { %v462_v20 = vpop.f32.mrf.mxu0  ;;  %v2159_v22 = vpack.c.b16 %v899_v18, %v899_v18 }
 0x106   : > { %v508_v21 = vadd.s32 1, %v1333_v17  ;;  %v495_v23 = vpop.f32.mrf.mxu1  ;;  %v2175_v51 = vshll.u32 %v506_v28, 8 }
 0x107   : > { %901 = vrot.lane.b32.xlu2 %v2159_v22, %s1817_s9  ;;  %s1132_s9 = sshll.u32 %s1129_s10, 4  ;;  %s1133_s9 = int_to_ptr.hbm [resolvable:$true] %s1132_s9 }
 0x108   : > { %vm509_vm2 = vcmp.gt.s32.totalorder %v508_v21, 0  ;;  %v547_v60 = vand.u32 65535, %v2175_v51  ;;  %v548_v61 = vshrl.u32 %v2175_v51, 16 }
 0x109   : > { %v510_v25 = vsel %vm509_vm2, %v508_v21, 0 }
 0x10a   : > { %v512_v26 = vand.u32 31, %v510_v25  ;;  %v2166_v29 = vshrl.u32 %v510_v25, 5 }
 0x10c   : > { %v2164_v27 = vsub.s32 32, %v512_v26  ;;  %v515_v31 = vshll.u32 %v1818_v30, %v512_v26  ;;  %v518_v33 = vshll.u32 %v1819_v32, %v512_v26  ;;  %v521_v37 = vshll.u32 %v1820_v35, %v512_v26 }
 0x10d   : > { %v524_v40 = vshll.u32 %v1821_v38, %v512_v26  ;;  %v527_v43 = vshll.u32 %v1822_v41, %v512_v26  ;;  %vm530_vm3 = vcmp.lt.s32.totalorder %v2166_v29, 1  ;;  %vm533_vm4 = vcmp.lt.s32.totalorder %v2166_v29, 4 }
 0x10e   : > { %v516_v34 = vshrl.u32 %v1819_v32, %v2164_v27  ;;  %v519_v36 = vshrl.u32 %v1820_v35, %v2164_v27  ;;  %v522_v39 = vshrl.u32 %v1821_v38, %v2164_v27  ;;  %v525_v42 = vshrl.u32 %v1822_v41, %v2164_v27 }
 0x10f   : > { %v528_v45 = vshrl.u32 %v1823_v44, %v2164_v27  ;;  %vm532_vm5 = vcmp.lt.s32.totalorder %v2166_v29, 3  ;;  %vm531_vm6 = vcmp.lt.s32.totalorder %v2166_v29, 2  ;;  %v514_v28 = vshrl.u32 %v1818_v30, %v2164_v27 }
 0x110   : > { %v517_v46 = vor.u32 %v516_v34, %v515_v31  ;;  %v520_v47 = vor.u32 %v519_v36, %v518_v33  ;;  %v523_v48 = vor.u32 %v522_v39, %v521_v37  ;;  %v526_v49 = vor.u32 %v525_v42, %v524_v40 }
 0x111   : > { %v529_v50 = vor.u32 %v528_v45, %v527_v43 }
 0x112   : > { %v538_v52 = vsel %vm530_vm3, %v517_v46, %v520_v47  ;;  %v542_v53 = vsel %vm530_vm3, %v520_v47, %v523_v48  ;;  %v539_v54 = vsel %vm533_vm4, %v526_v49, 920167782  ;;  %v535_v24 = vsel %vm533_vm4, %v523_v48, 2102212464 }
 0x113   : > { %v543_v55 = vsel %vm533_vm4, %v529_v50, 1326507024  ;;  %v540_v56 = vsel %vm532_vm5, %v523_v48, %v539_v54  ;;  %v534_v36 = vsel %vm530_vm3, %v514_v28, %v517_v46  ;;  %v536_v37 = vsel %vm532_vm5, %v520_v47, %v535_v24 }
 0x114   : > { %v544_v57 = vsel %vm532_vm5, %v526_v49, %v543_v55  ;;  %v541_v58 = vsel %vm531_vm6, %v538_v52, %v540_v56  ;;  %v537_v27 = vsel %vm531_vm6, %v534_v36, %v536_v37  ;;  %v656_v36 = vpop.permute.xlu0 %655 }
 0x115   : > { %v545_v59 = vsel %vm531_vm6, %v542_v53, %v544_v57  ;;  %v571_v0 = vand.u32 65535, %v541_v58  ;;  %v572_v1 = vshrl.u32 %v541_v58, 16  ;;  %v591_v44 = vmul.u32 %v2175_v51, %v537_v27 }
 0x116   : > { %v549_v62 = vand.u32 65535, %v545_v59  ;;  %v550_v63 = vshrl.u32 %v545_v59, 16 }
 0x117   : > { %v574_v5 = vmul.u32 %v572_v1, %v547_v60  ;;  %v575_v6 = vmul.u32 %v571_v0, %v548_v61  ;;  %v573_v11 = vmul.u32 %v571_v0, %v547_v60  ;;  %v576_v15 = vmul.u32 %v572_v1, %v548_v61 }
 0x118   : > { %v552_v2 = vmul.u32 %v550_v63, %v547_v60  ;;  %v553_v4 = vmul.u32 %v549_v62, %v548_v61  ;;  %v551_v7 = vmul.u32 %v549_v62, %v547_v60  ;;  %v554_v9 = vmul.u32 %v550_v63, %v548_v61 }
 0x119   : > { %v577_v12 = vshll.u32 %v574_v5, 16  ;;  %v579_v18 = vshll.u32 %v575_v6, 16  ;;  %v578_v34 = vshrl.u32 %v574_v5, 16  ;;  %v580_v40 = vshrl.u32 %v575_v6, 16 }
 0x11a   : > { %v555_v8 = vshll.u32 %v552_v2, 16  ;;  %v557_v13 = vshll.u32 %v553_v4, 16  ;;  %v556_v31 = vshrl.u32 %v552_v2, 16  ;;  %v558_v38 = vshrl.u32 %v553_v4, 16 }
 0x11b   : > { %vm581_vm8 = vc.u32 %v573_v11, %v577_v12  ;;  %v583_v20 = vadd.s32 %v577_v12, %v573_v11 }
 0x11c   : > { %vm559_vm7 = vc.u32 %v551_v7, %v555_v8  ;;  %v561_v14 = vadd.s32 %v555_v8, %v551_v7  ;;  %v582_v23 = vsel %vm581_vm8, 1, %v1816_v3  ;;  %vm822_vm8 = vcmask 130048  }
 0x11d   : > { %v560_v17 = vsel %vm559_vm7, 1, %v1816_v3  ;;  %v584_v26 = vadd.s32 %v582_v23, %v576_v15  ;;  %vm585_vm10 = vc.u32 %v583_v20, %v579_v18  ;;  %v587_v43 = vadd.s32 %v583_v20, %v579_v18 }
 0x11e   : > { %v562_v21 = vadd.s32 %v560_v17, %v554_v9  ;;  %vm563_vm9 = vc.u32 %v561_v14, %v557_v13  ;;  %v586_v33 = vsel %vm585_vm10, 1, %v1816_v3  ;;  %vm641_vm7 = vweird.f32 %v2151_v10 }
 0x11f   : > { %v564_v25 = vsel %vm563_vm9, 1, %v1816_v3  ;;  %v588_v35 = vadd.s32 %v586_v33, %v584_v26  ;;  %vm843_vm9 = vcmask 64512   ;;  %vm1091_vm10 = vcmask 72704  }
 0x120   : > { %v566_v32 = vadd.s32 %v564_v25, %v562_v21 }
 0x121   : > { %v589_v41 = vadd.s32 %v588_v35, %v578_v34  ;;  %v852_v34 = vsel %vm850_vm0, %v2155_v16, 0 }
 0x122   : > { %v567_v39 = vadd.s32 %v566_v32, %v556_v31  ;;  %861 = vmatpush.bf16.msra.mxu2 %v852_v34  ;;  %v1039_v34 = vld [vmem:[%s2136_s28] sm:$0xff] }
 0x123   : > { %v590_v30 = vadd.s32 %v589_v41, %v580_v40 }
 0x124   : > { %v568_v42 = vadd.s32 %v567_v39, %v558_v38 }
 0x125   : > { %v594_v3 = vadd.s32 1, %v590_v30 }
 0x126   : > { %vm593_vm11 = vc.u32 %v568_v42, %v587_v43  ;;  %v592_v29 = vadd.s32 %v587_v43, %v568_v42 }
 0x127   : > { %v595_v45 = vsel %vm593_vm11, %v594_v3, %v590_v30  ;;  %vm1101_vm11 = vcmask 220160  }
 0x128   : > { %v596_v48 = vadd.s32 %v595_v45, %v591_v44 }
 0x12a   : > { %v597_v46 = vadd.s32 536870912, %v596_v48 }
 0x12c   : > { %v598_v49 = vshrl.u32 %v597_v46, 30 }
 0x12e   : > { %v599_v50 = vshll.u32 %v598_v49, 30  ;;  %v622_v6 = vsub.s32 4, %v598_v49 }
 0x130   : > { %v600_v47 = vsub.s32 %v596_v48, %v599_v50  ;;  %v623_v12 = vsel %vm500_vm14, %v622_v6, %v598_v49 }
 0x131   : > { %v625_v15 = vsel %vm499_vm15, 0, %v623_v12 }
 0x132   : > { %vm601_vm12 = vcmp.lt.s32.totalorder %v600_v47, 0  ;;  %v602_v52 = vsub.s32 0, %v600_v47  ;;  %v642_v23 = vadd.s32 3, %v625_v15  ;;  %v804_v28 = vand.u32 3, %v625_v15 }
 0x134   : > { %v603_v53 = vsel %vm601_vm12, %v602_v52, %v600_v47  ;;  %v643_v31 = vand.u32 3, %v642_v23  ;;  %vm805_vm1 = vcmp.lt.s32.totalorder %v804_v28, 2  ;;  %vm806_vm2 = vcmp.eq.s32.totalorder %v804_v28, 0 }
 0x135   : > { %v604_v54 = vclz %v603_v53  ;;  %vm809_vm6 = vcmp.eq.s32.totalorder %v804_v28, 2  ;;  %vm1096_vm12 = vcmask 146432  }
 0x136   : > { %vm644_vm3 = vcmp.lt.s32.totalorder %v643_v31, 2  ;;  %vm645_vm4 = vcmp.eq.s32.totalorder %v643_v31, 0  ;;  %vm648_vm5 = vcmp.eq.s32.totalorder %v643_v31, 2 }
 0x137   : > { %v1334_v55 = vadd.s32 4294967294, %v604_v54 }
 0x139   : > { %vm1335_vm13 = vcmp.lt.s32.totalorder %v1334_v55, 0 }
 0x13a   : > { %v607_v56 = vsel %vm1335_vm13, 0, %v1334_v55  ;;  %vm1110_vm13 = vcmask 293888  }
 0x13b   : > { %v608_v57 = vsub.s32 32, %v607_v56  ;;  %v612_v58 = vsub.s32 4294967266, %v607_v56  ;;  %v609_v59 = vshll.u32 %v600_v47, %v607_v56 }
 0x13d   : > { %v610_v60 = vshrl.u32 %v592_v29, %v608_v57  ;;  %v613_v61 = vadd.s32 127, %v612_v58 }
 0x13f   : > { %v611_v51 = vor.u32 %v610_v60, %v609_v59  ;;  %v614_v62 = vshll.u32 %v613_v61, 23 }
 0x141   : > { %v615_v63 = vor.u32 4788187, %v614_v62  ;;  %v618_v1 = vcvt.s32.f32 %v611_v51 }
 0x143   : > { %v616_v0 = vand.u32 2147483647, %v615_v63 }
 0x145   : > { %v619_v2 = vmul.f32 %v618_v1, %v616_v0 }
 0x147   : > { %v620_v4 = vxor.u32 2147483648, %v619_v2 }
 0x149   : > { %v621_v5 = vsel %vm500_vm14, %v620_v4, %v619_v2 }
 0x14a   : > { %v624_v7 = vsel %vm499_vm15, %v2151_v10, %v621_v5 }
 0x14b   : > { %v626_v8 = vmul.f32 %v624_v7, %v624_v7 }
 0x14d   : > { %v627_v9 = vmul.f32 -0.001358992, %v626_v8  ;;  %v634_v11 = vmul.f32 -0.00019511016, %v626_v8 }
 0x14f   : > { %v628_v13 = vadd.f32 0.041655596, %v627_v9  ;;  %v635_v14 = vadd.f32 0.008332121, %v634_v11 }
 0x151   : > { %v629_v17 = vmul.f32 %v628_v13, %v626_v8  ;;  %v636_v18 = vmul.f32 %v635_v14, %v626_v8 }
 0x153   : > { %v630_v20 = vadd.f32 -0.4999988, %v629_v17  ;;  %v637_v21 = vadd.f32 -0.16666654, %v636_v18 }
 0x155   : > { %v631_v24 = vmul.f32 %v630_v20, %v626_v8  ;;  %v638_v25 = vmul.f32 %v637_v21, %v626_v8 }
 0x157   : > { %v632_v26 = vadd.f32 1.0, %v631_v24  ;;  %v639_v19 = vadd.f32 1.0, %v638_v25 }
 0x159   : > { %v640_v32 = vmul.f32 %v639_v19, %v624_v7  ;;  %v649_v33 = vxor.u32 2147483648, %v632_v26 }
 0x15b   : > { %v646_v35 = vxor.u32 2147483648, %v640_v32  ;;  %v650_v38 = vsel %vm648_vm5, %v649_v33, %v640_v32  ;;  %v811_v40 = vsel %vm809_vm6, %v649_v33, %v640_v32 }
 0x15d   : > { %v647_v37 = vsel %vm645_vm4, %v632_v26, %v646_v35  ;;  %v808_v39 = vsel %vm806_vm2, %v632_v26, %v646_v35 }
 0x15e   : > { %v651_v41 = vsel %vm644_vm3, %v647_v37, %v650_v38  ;;  %v812_v42 = vsel %vm805_vm1, %v808_v39, %v811_v40 }
 0x15f   : > { %v652_v43 = vsel %vm641_vm7, nan, %v651_v41  ;;  %v813_v27 = vsel %vm641_vm7, nan, %v812_v42  ;;  %v1040_v41 = vld [vmem:[%s2136_s28 + $0x8] sm:$0xff] }
 0x160   : > { %v658_v16 = vmul.f32 %v656_v36, %v652_v43  ;;  %v814_v30 = vmul.f32 %v813_v27, %v656_v36 }
 0x161   : > { %v902_v10 = vpop.permute.xlu2 %901 }
 0x162   : > { %v659_v3 = vpack.c.bf16 %v658_v16, %v658_v16  ;;  %v815_v44 = vpack.c.bf16 %v814_v30, %v814_v30  ;;  %v910_v52 = vsel %vm850_vm0, %v902_v10, 0 }
 0x163   : > { %919 = vmatpush.bf16.msra.mxu3 %v910_v52  ;;  %v1042_v52 = vld [vmem:[%s2136_s28 + $0x18] sm:$0xff] }
 0x164   : > { %v818_v45 = vunpack.c.l.b16 %v815_v44  ;;  %v874_v48 = vunpack.c.l.b16 %v659_v3 }
 0x166   : > { %v819_v46 = vpack.c.b16 %v818_v45, %v818_v45  ;;  %v875_v49 = vpack.c.b16 %v874_v48, %v874_v48 }
 0x168   : > { %820 = vrot.lane.b32.xlu0 %v819_v46, %s1824_s16  ;;  %931 = vrot.lane.b32.xlu2 %v875_v49, %s1825_s14  ;;  %s1116_s16 = scalar_lea.sflag [#allocation4], %s2410_s8 }
 0x169   : > { %876 = vrot.lane.b32.xlu1 %v875_v49, %s1826_s3 }
 0x170   : > { %933 = vrot.lane.b32.xlu0 %v819_v46, %s1826_s3  ;;  %985 = vrot.lane.b32.xlu2 %v875_v49, %s1827_s13 }
 0x178   : > { %987 = vrot.lane.b32.xlu0 %v819_v46, %s1825_s14  ;;  %955 = vrot.lane.b32.xlu2 %v2159_v22, %s1828_s15  ;;  %s1654_s14 = sshra.s32 %s1133_s9, 4  ;;  %s1655_s14 = int_to_ptr.hbm [resolvable:$true] %s1654_s14 }
 0x179   : > { %s1656_s3 = scalar_lea.hbm %s1655_s14, 32  ;;  %p1661_p7 = scmp.lt.s32.totalorder %s1655_s14, %s2408_s4 }
 0x17a   : > { %p1657_p4 = scmp.ne.s32.totalorder %s1655_s14, %s1656_s3 }
 0x17c   : > { %p1658_p0 = pnand %p1657_p4, %p1995_p11 }
 0x17e   : > { %p1659_p5 = pneg %p1658_p0 }
 0x180   : > { %1009 = vrot.lane.b32.xlu0 %v2159_v22, %s1829_s19  ;;  %s1660_s19 = scalar_lea.hbm %s2408_s4, 128 }
 0x181   : > { %p1662_p6 = scmp.lt.s32.totalorder %s1660_s19, %s1656_s3 }
 0x183   : > { %p1663_p9 = por %p1662_p6, %p1661_p7 }
 0x185   : > { %p1664_p10 = pnand %p1663_p9, %p1659_p5 }
 0x1c2   : > { %v932_v50 = vpop.permute.xlu2 %931 }
 0x1ca   : > { %v986_v47 = vpop.permute.xlu2 %985 }
 0x1d2   : > { %v956_v53 = vpop.permute.xlu2 %955 }
 0x1d3   : > { %v964_v54 = vsel %vm850_vm0, %v956_v53, 0 }
 0x1d4   : > { %973 = vmatpush.bf16.msrb.mxu0 %v964_v54  ;;  %1359 = vmatpush.bf16.msrb.mxu2 %v964_v54 }
 0x1da   : > { %v821_v55 = vpop.permute.xlu0 %820 }
 0x1db   : > { %v877_v56 = vpop.permute.xlu1 %876  ;;  %v825_v29 = vsel %vm822_vm8, %v659_v3, %v821_v55 }
 0x1dc   : > { %v880_v57 = vsel %vm822_vm8, %v877_v56, %v815_v44  ;;  %v1041_v44 = vld [vmem:[%s2136_s28 + $0x10] sm:$0xff] }
 0x1dd   : > { %1538 = vxpose.binary.xlu1.c.b16.start.end [1/2] (short) (narrow) %v880_v57, %v825_v29, 32 }
 0x1e2   : > { %v934_v58 = vpop.permute.xlu0 %933 }
 0x1e3   : > { %v937_v22 = vsel %vm822_vm8, %v932_v50, %v934_v58 }
 0x1ea   : > { %v988_v59 = vpop.permute.xlu0 %987 }
 0x1eb   : > { %v991_v60 = vsel %vm822_vm8, %v986_v47, %v988_v59 }
 0x1ec   : > { %1543 = vxpose.binary.xlu2.c.b16.start.end [1/2] (short) (narrow) %v991_v60, %v937_v22, 32 }
 0x1f2   : > { %v1010_v61 = vpop.permute.xlu0 %1009 }
 0x1f3   : > { %v1018_v51 = vsel %vm850_vm0, %v1010_v61, 0 }
 0x1f4   : > { %1027 = vmatpush.bf16.msrb.mxu1 %v1018_v51  ;;  %1360 = vmatpush.bf16.msrb.mxu3 %v1018_v51 }
 0x289   : > { %v1539_v62 = vpop.trf.xlu1 }
 0x28a   : > { %1339 = vmatmul.msk.bf16.vlgmr.msra.gmra.mxu2 %vm843_vm9, %v1539_v62 }
 0x28d   : > { %v1544_v63 = vpop.trf.xlu2 }
 0x28e   : > { %1343 = vmatmul.msk.bf16.vlgmr.msrb.gmra.mxu0 %vm843_vm9, %v1544_v63 }
 0x291   : > { %v1540_v0 = vpop.trf.xlu1 }
 0x292   : > { %1341 = vmatmul.msk.bf16.vlgmr.msra.gmra.mxu3 %vm843_vm9, %v1540_v0 }
 0x295   : > { %v1545_v1 = vpop.trf.xlu2 }
 0x296   : > { %1345 = vmatmul.msk.bf16.vlgmr.msrb.gmra.mxu1 %vm843_vm9, %v1545_v1 }
 0x299   : > { %v1541_v2 = vpop.trf.xlu1 }
 0x29a   : > { %1340 = vmatmul.msk.bf16.gmra.mxu2 %vm843_vm9, %v1541_v2 }
 0x29d   : > { %v1546_v5 = vpop.trf.xlu2 }
 0x2a1   : > { %v1542_v4 = vpop.trf.xlu1 }
 0x2a2   : > { %1342 = vmatmul.msk.bf16.gmra.mxu3 %vm843_vm9, %v1542_v4 }
 0x2a5   : > { %v1547_v6 = vpop.trf.xlu2 }
 0x2aa   : > { %1344 = vmatmul.msk.bf16.vlgmr.msrb.gmra.mxu2 %vm843_vm9, %v1546_v5 }
 0x2b2   : > { %1346 = vmatmul.msk.bf16.vlgmr.msrb.gmra.mxu3 %vm843_vm9, %v1547_v6 }
 0x30b   : > { %v975_v7 = vpop.f32.mrf.mxu0 }
 0x30d   : > { %v863_v12 = vpop.f32.mrf.mxu2 }
 0x313   : > { %v977_v8 = vpop.f32.mrf.mxu0  ;;  %v1029_v18 = vpop.f32.mrf.mxu1 }
 0x314   : > { %1065 = vrot.lane.b32.xlu2 %v977_v8, %s1830_s17 }
 0x315   : > { %v921_v9 = vpop.f32.mrf.mxu3  ;;  %v865_v14 = vpop.f32.mrf.mxu2 }
 0x316   : > { %1047 = vrot.lane.b32.xlu0 %v921_v9, %s1831_s5 }
 0x31b   : > { %v1031_v21 = vpop.f32.mrf.mxu1 }
 0x31d   : > { %v923_v11 = vpop.f32.mrf.mxu3  ;;  %v868_v17 = vpop.f32.mrf.mxu2 }
 0x31e   : > { %1049 = vrot.lane.b32.xlu0 %v923_v11, %s1831_s5 }
 0x325   : > { %v926_v13 = vpop.f32.mrf.mxu3  ;;  %v870_v20 = vpop.f32.mrf.mxu2 }
 0x326   : > { %1051 = vrot.lane.b32.xlu0 %v926_v13, %s1831_s5 }
 0x32d   : > { %v928_v15 = vpop.f32.mrf.mxu3  ;;  %v980_v23 = vpop.f32.mrf.mxu2 }
 0x32e   : > { %1063 = vrot.lane.b32.xlu0 %v975_v7, %s1830_s17  ;;  %1053 = vrot.lane.b32.xlu1 %v928_v15, %s1831_s5 }
 0x335   : > { %v1034_v24 = vpop.f32.mrf.mxu3  ;;  %v982_v25 = vpop.f32.mrf.mxu2 }
 0x336   : > { %1079 = vrot.lane.b32.xlu0 %v1029_v18, %s1832_s21 }
 0x33d   : > { %v1036_v26 = vpop.f32.mrf.mxu3 }
 0x33e   : > { %1081 = vrot.lane.b32.xlu0 %v1031_v21, %s1832_s21 }
 0x346   : > { %1067 = vrot.lane.b32.xlu0 %v980_v23, %s1830_s17 }
 0x34e   : > { %1083 = vrot.lane.b32.xlu0 %v1034_v24, %s1832_s21 }
 0x356   : > { %1069 = vrot.lane.b32.xlu0 %v982_v25, %s1830_s17 }
 0x35e   : > { %1085 = vrot.lane.b32.xlu0 %v1036_v26, %s1832_s21 }
 0x36e   : > { %v1066_v40 = vpop.permute.xlu2 %1065 }
 0x388   : > { %v1048_v19 = vpop.permute.xlu0 %1047 }
 0x389   : > { %v1092_v33 = vsel %vm1091_vm10, %v863_v12, %v1048_v19 }
 0x390   : > { %v1050_v28 = vpop.permute.xlu0 %1049 }
 0x391   : > { %v1093_v39 = vsel %vm1091_vm10, %v865_v14, %v1050_v28 }
 0x392   : > { %v1098_v42 = vsel %vm1096_vm12, %v1093_v39, %v1066_v40 }
 0x398   : > { %v1052_v31 = vpop.permute.xlu0 %1051 }
 0x399   : > { %v1094_v3 = vsel %vm1091_vm10, %v868_v17, %v1052_v31 }
 0x3a0   : > { %v1064_v32 = vpop.permute.xlu0 %1063  ;;  %v1054_v50 = vpop.permute.xlu1 %1053 }
 0x3a1   : > { %v1097_v35 = vsel %vm1096_vm12, %v1092_v33, %v1064_v32  ;;  %v1095_v47 = vsel %vm1091_vm10, %v870_v20, %v1054_v50 }
 0x3a8   : > { %v1080_v36 = vpop.permute.xlu0 %1079 }
 0x3a9   : > { %v1102_v37 = vsel %vm1101_vm11, %v1097_v35, %v1080_v36 }
 0x3aa   : > { %v1106_v38 = vadd.f32 %v1102_v37, %v1039_v34 }
 0x3ac   : > { %1111 = vst.msk [vmem:[%s2136_s28] sm:$0xff] %vm1110_vm13, %v1106_v38 }
 0x3b0   : > { %v1082_v43 = vpop.permute.xlu0 %1081 }
 0x3b1   : > { %v1103_v27 = vsel %vm1101_vm11, %v1098_v42, %v1082_v43 }
 0x3b2   : > { %v1107_v16 = vadd.f32 %v1103_v27, %v1040_v41 }
 0x3b4   : > { %1112 = vst.msk [vmem:[%s2136_s28 + $0x8] sm:$0xff] %vm1110_vm13, %v1107_v16 }
 0x3b8   : > { %v1068_v30 = vpop.permute.xlu0 %1067 }
 0x3b9   : > { %v1099_v45 = vsel %vm1096_vm12, %v1094_v3, %v1068_v30 }
 0x3c0   : > { %v1084_v48 = vpop.permute.xlu0 %1083 }
 0x3c1   : > { %v1104_v46 = vsel %vm1101_vm11, %v1099_v45, %v1084_v48 }
 0x3c2   : > { %v1108_v49 = vadd.f32 %v1104_v46, %v1041_v44 }
 0x3c4   : > { %1113 = vst.msk [vmem:[%s2136_s28 + $0x10] sm:$0xff] %vm1110_vm13, %v1108_v49 }
 0x3c8   : > { %v1070_v10 = vpop.permute.xlu0 %1069 }
 0x3c9   : > { %v1100_v53 = vsel %vm1096_vm12, %v1095_v47, %v1070_v10 }
 0x3d0   : > { %v1086_v54 = vpop.permute.xlu0 %1085 }
 0x3d1   : > { %v1105_v55 = vsel %vm1101_vm11, %v1100_v53, %v1086_v54 }
 0x3d2   : > { %v1109_v56 = vadd.f32 %v1105_v55, %v1042_v52 }
 0x3d4   : > { %1114 = vst.msk [vmem:[%s2136_s28 + $0x18] sm:$0xff] %vm1110_vm13, %v1109_v56 }
 0x3d5   : > { %1667 = shalt.err (!%p1664_p10)
}
 0x3d6   : > { %s1833_s28 = smov 128   ;;  %s1834_s21 = smov 8  }
 0x3d7   : > { %1367 = dma.vmem_to_hbm [thread:$0]  (%p1995_p11), %s1131_s11, 512, %s1133_s9, %s1116_s16, %s1833_s28, %s1833_s28, %s1834_s21  }
 0x3d8 PF: > { %s2411_s7 = sld [smem:[#allocation13_spill]]  ;;  %p1385_p13 = scmp.ge.s32.totalorder %s1810_s12, 2 }
 0x3da   : > { %p1381_p8 = pnand %p1385_p13, %p2003_p1 }
 0x3dc   : > { %p1382_p3 = pneg %p1381_p8 }
 0x3de   : > { %s1147_s1 = sand.u32 1, %s2411_s7  }
 0x3df   : > { %s1148_s30 = scalar_lea.sflag [#allocation4], %s1147_s1 }
 0x3e0   : > { %1745 = dma.done.wait (%p1382_p3), %s1148_s30, 512  }
 0x3e1   : > { %1747 = vsyncadd (%p1382_p3), %s1148_s30, 4294966784  ;;  %s23_s12 = sadd.s32 1, %s1810_s12   ;;  %s2414_s21 = sld [smem:[#allocation14_spill]] }
 0x3e2   : > { %p2280_p2 = scmp.ge.s32.totalorder %s23_s12, 10   ;;  %s2415_s2 = smov %s2082_s22 }
 0x3e3   : > { %s2416_s27 = sld [smem:[#allocation15_spill]]  ;;  %s2425_s22 = smov %s1758_s23 }
 0x3e4   : > { %s2417_s28 = sld [smem:[#allocation16_spill]]  ;;  %s2426_s23 = smov %s2085_s24 }
 0x3e5   : > { %s2418_s29 = sld [smem:[#allocation25_spill]]  ;;  %s2427_s24 = smov %s1766_s25 }
 0x3e6   : > { %s2419_s30 = sld [smem:[#allocation19_spill]]  ;;  %s2428_s25 = smov %s1770_s26 }
 0x3e7   : > { %s2420_s7 = sld [smem:[#allocation20_spill]]  ;;  %s2429_s26 = smov %s2415_s2 }
 0x3e8   : > { %s2421_s8 = sld [smem:[#allocation21_spill]]  ;;  %22 = sbr.rel (!%p2280_p2) target bundleno = 20 (0x14), region = 118 }
 0x3e9   : > { %s2422_s9 = sld [smem:[#allocation22_spill]] }
 0x3ea   : > { %s2423_s10 = sld [smem:[#allocation23_spill]] }
 0x3eb   : > { %s2424_s11 = sld [smem:[#allocation27_spill]] }
 0x3ed   :  { %1154 = vsyncpa [#allocation3], 1 }
 0x3ee   :  { %1156 = vsyncpa [#allocation3 + $0x1], 1 }
 0x3ef   :  { %1157 = vsyncpa [#allocation6], 1 }
 0x3f0   :  { %1158 = vsyncpa [#allocation4], 1 }
 0x3f1   :  { %1160 = vsyncpa [#allocation4 + $0x1], 1 }

// kernel: tpu_custom_call.1
= control target key start
LH: loop header
LB: loop body
LE: loop exit
PB: predicated region body
PF: predicated region fallthrough
CT: control target
= control target key end

     0   :  { %s2335_s0 = inlined_call_operand.hbm [shape: bf16[2,16,32], index: 0, kind: input, shape index: {}]   ;;  %s2336_s1 = inlined_call_operand.vmem [shape: bf16[2,32,64], index: 1, kind: input, shape index: {}]   ;;  %s2337_s2 = inlined_call_operand.vmem [shape: f32[2,1,64], index: 2, kind: input, shape index: {}]   ;;  %s2338_s3 = inlined_call_operand.hbm [shape: bf16[2,32,36], index: 3, kind: input, shape index: {}]   ;;  %s2339_s4 = inlined_call_operand.hbm [shape: f32[2,1,36], index: 4, kind: input, shape index: {}]   ;;  %s2340_s5 = inlined_call_operand.vmem [shape: f32[2,16,1], index: 5, kind: input, shape index: {}]   ;;  %s2341_s6 = inlined_call_operand.hbm [shape: f32[2,2,32,36], index: 6, kind: output, shape index: {}]  }
   0x1   :  { %2359 = sst [smem:[#allocation29_spill]] %s2335_s0 }
   0x2   :  { %2360 = sst [smem:[#allocation30_spill]] %s2336_s1 }
   0x3   :  { %2361 = sst [smem:[#allocation31_spill]] %s2337_s2 }
   0x4   :  { %2362 = sst [smem:[#allocation32_spill]] %s2338_s3 }
   0x5   :  { %2363 = sst [smem:[#allocation33_spill]] %s2339_s4 }
   0x6   :  { %2364 = sst [smem:[#allocation34_spill]] %s2340_s5 }
   0x7   :  { %2365 = sst [smem:[#allocation35_spill]] %s2341_s6 }
   0x8   :  { %11 = vsyncpa [#allocation3], 0 }
   0x9   :  { %13 = vsyncpa [#allocation3 + $0x1], 0 }
   0xa   :  { %14 = vsyncpa [#allocation6], 0 }
   0xb   :  { %16 = vsyncpa [#allocation6 + $0x1], 0 }
   0xc   :  { %17 = vsyncpa [#allocation4], 0 }
   0xd   :  { %19 = vsyncpa [#allocation4 + $0x1], 0  ;;  %s1890_s21 = smov 0   ;;  %s1892_s22 = smov 0  }
   0xe   :  { %s1894_s23 = smov 0   ;;  %s1896_s24 = smov 0  }
   0xf   :  { %s1898_s25 = smov 0   ;;  %s1900_s26 = smov 0  }
  0x10   :  { %s1902_s27 = smov 0   ;;  %s1904_s28 = smov 0  }
  0x11   :  { %s1906_s29 = smov 0   ;;  %s1908_s30 = smov 0  }
  0x12   :  { %s1910_s7 = smov 0   ;;  %s1912_s8 = smov 0  }
  0x13   :  { %s1914_s9 = smov 0   ;;  %s1916_s10 = smov 0  }
  0x14   :  { %s1918_s11 = smov 0   ;;  %s1920_s12 = smov 0  }
  0x15 LB: > { %2366 = sst [smem:[#allocation12_spill]] %s1771_s21  ;;  %p61_p0 = scmp.eq.s32.totalorder %s1831_s12, 0  ;;  %s1831_s12 = sphi %s1920_s12, %s25_s12   ;;  %s1827_s11 = sphi %s1918_s11, %s2424_s11   ;;  %s1823_s10 = sphi %s1916_s10, %s2423_s10   ;;  %s1819_s9 = sphi %s1914_s9, %s2422_s9   ;;  %s1815_s8 = sphi %s1912_s8, %s2421_s8   ;;  %s1811_s7 = sphi %s1910_s7, %s2420_s7   ;;  %s1807_s30 = sphi %s1908_s30, %s2419_s30   ;;  %s1803_s29 = sphi %s1906_s29, %s2418_s29   ;;  %s1799_s28 = sphi %s1904_s28, %s2417_s28   ;;  %s1795_s27 = sphi %s1902_s27, %s2416_s27   ;;  %s1791_s26 = sphi %s1900_s26, %s2429_s26   ;;  %s1787_s25 = sphi %s1898_s25, %s2428_s25   ;;  %s1783_s24 = sphi %s1896_s24, %s2427_s24   ;;  %s1779_s23 = sphi %s1894_s23, %s2414_s23   ;;  %s1775_s22 = sphi %s1892_s22, %s2426_s22   ;;  %s1771_s21 = sphi %s1890_s21, %s2425_s21  }
  0x16   : > { %2367 = sst [smem:[#allocation13_spill]] %s1779_s23  ;;  %p138_p1 = scmp.ne.s32.totalorder %s1791_s26, %s1787_s25 }
  0x17   : > { %2368 = sst [smem:[#allocation14_spill]] %s1799_s28  ;;  %p144_p2 = scmp.ne.s32.totalorder %s1787_s25, %s1783_s24 }
  0x18   : > { %2369 = sst [smem:[#allocation15_spill]] %s1803_s29  ;;  %p1410_p3 = scmp.lt.s32.totalorder %s1831_s12, 8 }
  0x19   : > { %2370 = sst [smem:[#allocation16_spill]] %s1807_s30  ;;  %p140_p4 = por %p138_p1, %p61_p0 }
  0x1a   : > { %2371 = sst [smem:[#allocation17_spill]] %s1811_s7  ;;  %s285_s14 = sand.u32 1, %s1831_s12  }
  0x1b   : > { %2372 = sst [smem:[#allocation18_spill]] %s1815_s8  ;;  %s2343_s15 = sand.u32 1, %s1791_s26  }
  0x1c   : > { %2373 = sst [smem:[#allocation19_spill]] %s1819_s9  ;;  %s1330_s16 = sshll.u32 %s2343_s15, 4 }
  0x1d   : > { %2374 = sst [smem:[#allocation20_spill]] %s1823_s10  ;;  %s1380_s17 = sshll.u32 %s1827_s11, 4 }
  0x1e   : > { %2375 = sst [smem:[#allocation21_spill]] %s1827_s11  ;;  %s289_s6 = scalar_lea.vmem [#allocation5], %s1330_s16 }
  0x1f   : > { %s2376_s3 = sld [smem:[#allocation32_spill]]  ;;  %s297_s5 = sshll.u32 %s289_s6, 4  ;;  %s298_s5 = int_to_ptr.vmem [resolvable:$true] %s297_s5 }
  0x20   : > { %p1989_p5 = pnand %p1410_p3, %p140_p4  ;;  %p1333_p6 = scmp.ge.s32.totalorder %s1831_s12, 1 }
  0x21   : > { %p333_p7 = scmp.lt.s32.totalorder %s1831_s12, 9  ;;  %s1833_s6 = smov 64  }
  0x22   : > { %s1834_s16 = smov 4   ;;  %s2005_s19 = sadd.s32 4294967295, %s1831_s12  }
  0x23   : > { %p2000_p8 = pnand %p1333_p6, %p333_p7  ;;  %s40_s15 = sadd.s32 1, %s1823_s10 }
  0x24   : > { %s53_s2 = sadd.s32 1, %s1803_s29  ;;  %p60_p10 = scmp.ne.s32.totalorder %s1803_s29, %s1799_s28 }
  0x25   : > { %s294_s20 = scalar_lea.hbm %s2376_s3, %s1380_s17  ;;  %s1995_s17 = scalar_lea.sflag [#allocation6], %s285_s14 }
  0x26   : > { %s295_s13 = sshll.u32 %s294_s20, 4  ;;  %s37_s14 = sadd.s32 1, %s1819_s9  ;;  %s296_s13 = int_to_ptr.hbm [resolvable:$true] %s295_s13 }
  0x27   : > { %1402 = dma.hbm_to_vmem [thread:$0]  (!%p1989_p5), %s296_s13, 256, %s298_s5, %s1995_s17, %s1833_s6, %s1833_s6, %s1834_s16  }
  0x28   : > { %p38_p9 = scmp.ge.s32.totalorder %s37_s14, 2  ;;  %s44_s3 = sadd.s32 1, %s1827_s11 }
  0x29   : > { %p66_p12 = scmp.ne.s32.totalorder %s1799_s28, %s1795_s27  ;;  %p2023_p13 = por %p61_p0, %p60_p10 }
  0x2a   : > { %s2431_s14 = smov (%p38_p9, %s37_s14), 0  ;;  %s2433_s15 = smov (!%p38_p9, %s40_s15), %s1823_s10 }
  0x2b   : > { %2379 = sst [smem:[#allocation22_spill]] %s2431_s14  ;;  %s49_s5 = ssub.s32 %s1819_s9, %s2431_s14 }
  0x2c   : > { %p42_p11 = scmp.ge.s32.totalorder %s2433_s15, 2  ;;  %p67_p1 = scmp.eq.s32.totalorder %s2005_s19, 0 }
  0x2d   : > { %s213_s30 = sadd.s32 1, %s1779_s23  ;;  %s2389_s8 = sadd.s32 4294967294, %s1831_s12  }
  0x2e   : > { %s2435_s15 = smov (%p42_p11, %s2433_s15), 0  ;;  %s2437_s3 = smov (!%p42_p11, %s44_s3), %s1827_s11 }
  0x2f   : > { %2381 = sst [smem:[#allocation23_spill]] %s2435_s15  ;;  %s48_s6 = ssub.s32 %s1823_s10, %s2435_s15 }
  0x30   : > { %p2033_p4 = por %p67_p1, %p66_p12  ;;  %p46_p0 = scmp.ge.s32.totalorder %s2437_s3, 2 }
  0x31   : > { %s50_s27 = sor.u32 %s49_s5, %s48_s6  ;;  %p2040_p7 = por %p144_p2, %p67_p1 }
  0x32   : > { %p51_p6 = scmp.eq.s32.totalorder %s50_s27, 0  ;;  %s2439_s3 = smov (%p46_p0, %s2437_s3), 0 }
  0x33   : > { %2384 = sst [smem:[#allocation24_spill]] %s2439_s3  ;;  %s128_s14 = ssub.s32 %s1827_s11, %s2439_s3 }
  0x34   : > { %s2047_s15 = scalar_select %p51_p6, %s1803_s29, %s53_s2  }
  0x35   : > { %p129_p9 = scmp.eq.s32.totalorder %s128_s14, 0  ;;  %s210_s7 = sor.u32 %s128_s14, %s48_s6 }
  0x36   : > { %2385 = sst [smem:[#allocation25_spill]] %s2047_s15  ;;  %p211_p10 = scmp.eq.s32.totalorder %s210_s7, 0 }
  0x37   : > { %p223_p11 = scmp.ne.s32.totalorder %s1779_s23, %s1775_s22  ;;  %s2386_s5 = sadd.s32 1, %s1791_s26 }
  0x38   : > { %s2057_s27 = scalar_select %p129_p9, %s1791_s26, %s2386_s5  }
  0x39   : > { %s2060_s24 = scalar_select %p211_p10, %s1779_s23, %s213_s30  }
  0x3a   : > { %2387 = sst [smem:[#allocation26_spill]] %s2057_s27  ;;  %p224_p2 = scmp.eq.s32.totalorder %s2005_s19, 7 }
  0x3b   : > { %2388 = sst [smem:[#allocation27_spill]] %s2060_s24  ;;  %p229_p12 = scmp.ne.s32.totalorder %s1775_s22, %s1771_s21 }
  0x3c   : > { %p230_p1 = scmp.eq.s32.totalorder %s2389_s8, 7  ;;  %s250_s2 = sand.u32 1, %s1803_s29  }
  0x3d   : > { %p2068_p0 = por %p224_p2, %p223_p11  ;;  %s1327_s14 = sshll.u32 %s250_s2, 2 }
  0x3e   : > { %p2072_p6 = por %p230_p1, %p229_p12  ;;  %s1328_s6 = sshll.u32 %s1823_s10, 1 }
  0x3f   : > { %s258_s5 = sadd.s32 %s1819_s9, %s1328_s6  ;;  %s254_s30 = scalar_lea.vmem [#allocation2], %s1327_s14 }
  0x40   : > { %s2391_s7 = scalar_select %p2072_p6, 1, 0 }
  0x41   : > { %s264_s15 = sshll.u32 %s254_s30, 4  ;;  %s1329_s27 = sshll.u32 %s258_s5, 2  ;;  %s265_s15 = int_to_ptr.vmem [resolvable:$true] %s264_s15 }
  0x42   : > { %2392 = sst [smem:[#allocation28_spill]] %s2391_s7  ;;  %p1397_p9 = pnand %p1410_p3, %p2023_p13 }
  0x43   : > { %s2393_s0 = sld [smem:[#allocation29_spill]]  ;;  %s251_s21 = scalar_lea.sflag [#allocation3], %s250_s2 }
  0x44   : > { %s2394_s4 = sld [smem:[#allocation33_spill]]  ;;  %s2395_s6 = sand.u32 1, %s1791_s26  }
  0x45   : > { %s310_s9 = scalar_lea.vmem [#allocation7], %s2395_s6  ;;  %s339_s29 = sand.u32 (!%p2000_p8), 1, %s1799_s28  }
  0x46   : > { %s317_s30 = sshll.u32 %s310_s9, 4  ;;  %s2097_s13 = sshll.u32 (!%p2000_p8), %s339_s29, 2  ;;  %s318_s30 = int_to_ptr.vmem [resolvable:$true] %s317_s30 }
  0x49   : > { %s260_s24 = scalar_lea.hbm %s2393_s0, %s1329_s27  ;;  %337 = sbr.rel (%p2000_p8) target bundleno = 969 (0x3c9), region = 44 }
  0x4a   : > { %s262_s23 = sshll.u32 %s260_s24, 4  ;;  %s313_s14 = scalar_lea.hbm %s2394_s4, %s1827_s11  ;;  %s263_s23 = int_to_ptr.hbm [resolvable:$true] %s262_s23 }
  0x4b   : > { %1399 = dma.hbm_to_vmem [thread:$0]  (!%p1397_p9), %s263_s23, 64, %s265_s15, %s251_s21  }
  0x4c   : > { %s315_s5 = sshll.u32 %s313_s14, 4  ;;  %s340_s21 = scalar_lea.sflag (!%p2000_p8), [#allocation3], %s339_s29  ;;  %s316_s5 = int_to_ptr.hbm [resolvable:$true] %s315_s5 }
  0x4d   : > { %1405 = dma.hbm_to_vmem [thread:$0]  (!%p1989_p5), %s316_s5, 16, %s318_s30, %s1995_s17  }
  0x4e   : > { %1758 = dma.done.wait (%p2033_p4), %s340_s21, 64  }
  0x4f   : > { %1760 = vsyncadd (%p2033_p4), %s340_s21, 4294967232  ;;  %s349_s1 = sand.u32 1, %s2005_s19   ;;  %s351_s9 = sand.u32 1, %s1787_s25  }
  0x50   : > { %s2106_s10 = sshll.u32 %s351_s9, 4  ;;  %s350_s15 = scalar_lea.sflag [#allocation6], %s349_s1 }
  0x51   : > { %1762 = dma.done.wait (%p2040_p7), %s350_s15, 272  }
  0x52   : > { %1764 = vsyncadd (%p2040_p7), %s350_s15, 4294967024  ;;  %s2396_s18 = sld [smem:[#allocation18_spill]]  ;;  %s2356_s19 = sand.u32 1, %s1775_s22  }
  0x53   : > { %s2397_s16 = sld [smem:[#allocation17_spill]]  ;;  %s1336_s24 = sshll.u32 %s2356_s19, 5 }
  0x54   : > { %s2398_s27 = sld [smem:[#allocation16_spill]]  ;;  %s362_s11 = scalar_lea.vmem [#allocation7], %s351_s9 }
  0x55   : > { %s2399_s8 = sld [smem:[#allocation31_spill]]  ;;  %s2135_s28 = scalar_lea.vmem [#allocation8], %s1336_s24 }
  0x56   : > { %s2400_s5 = sld [smem:[#allocation30_spill]] }
  0x57   : > { %s2401_s0 = sld [smem:[#allocation34_spill]] }
  0x58   : > { %p417_p3 = scmp.lt.s32.totalorder %s2396_s18, 1 }
  0x59   : > { %p425_p5 = scmp.lt.s32.totalorder %s2397_s16, 1 }
  0x5a   : > { %s2441_s18 = smov (!%p417_p3, %s2396_s18), 1  ;;  %p427_p8 = scmp.lt.s32.totalorder %s2398_s27, 1 }
  0x5b   : > { %s2443_s16 = smov (!%p425_p5, %s2397_s16), 1  ;;  %s1381_s20 = sshll.u32 %s2441_s18, 4 }
  0x5c   : > { %s424_s14 = scalar_lea.vmem %s2399_s8, %s2441_s18  ;;  %s421_s29 = scalar_lea.vmem %s2400_s5, %s1381_s20 }
  0x5d   : > { %s1339_s21 = sshll.u32 %s2443_s16, 1  ;;  %p1341_p13 = scmp.ne.s32.totalorder %s2398_s27, 0 }
  0x5e   : > { %s428_s1 = scalar_select %p427_p8, %s2398_s27, 1 }
  0x5f   : > { %437 = sbr.rel (%p1341_p13) target bundleno = 105 (0x69), region = 60 }
  0x60   : > { %s430_s15 = sadd.s32 %s1339_s21, %s428_s1 }
  0x61   : > { %s1340_s19 = sshll.u32 %s430_s15, 3 }
  0x62   : > { %s432_s4 = scalar_lea.vmem %s2401_s0, %s1340_s19 }
  0x64   : > { %vm438_vm0 = vcmask 293888   ;;  %v1835_v0 = vmov 0.0  }
  0x65   : > { %439 = vst.msk [vmem:[%s2135_s28] sm:$0xff] %vm438_vm0, %v1835_v0 }
  0x66   : > { %440 = vst.msk [vmem:[%s2135_s28 + $0x8] sm:$0xff] %vm438_vm0, %v1835_v0 }
  0x67   : > { %441 = vst.msk [vmem:[%s2135_s28 + $0x10] sm:$0xff] %vm438_vm0, %v1835_v0 }
  0x68   : > { %442 = vst.msk [vmem:[%s2135_s28 + $0x18] sm:$0xff] %vm438_vm0, %v1835_v0 }
  0x69 PF: > { %v1383_v1 = vld [vmem:[%s421_s29 + $0x8] sm:$0xff]  ;;  %s2402_s0 = scalar_lea.vmem [#allocation5], %s2106_s10  ;;  %v1836_v3 = vmov 0   ;;  %v514_v4 = vld [vmem:[%s432_s4] sm:$0xff]  ;;  %s2404_s9 = scalar_lea.vmem [#allocation2], %s2097_s13  ;;  %vm464_vm1 = vcmask 261120  }
  0x6a   : > { %v1385_v2 = vld [vmem:[%s2402_s0 + $0x8] sm:$0xff]  ;;  %1562 = vset.pattern.permute.xlu0 %v1836_v3  ;;  %474 = vmatpush.bf16.msra.mxu0 %v1383_v1  ;;  %s2403_s23 = smov %s2402_s0  ;;  %s1837_s4 = smov 119   ;;  %v1838_v30 = vmov 683565275   ;;  %v1839_v32 = vmov 2475754826  }
  0x6b   : > { %v1382_v5 = vld [vmem:[%s421_s29] sm:$0xff]  ;;  %672 = vperm.xlu0 %1562, %v514_v4   ;;  %507 = vmatpush.bf16.msra.mxu1 %v1385_v2  ;;  %v1840_v35 = vmov 2131351028   ;;  %v1841_v38 = vmov 2102212464   ;;  %vm867_vm0 = vcmask 1043456  }
  0x6c   : > { %v1384_v6 = vld [vmem:[%s2403_s23] sm:$0xff]  ;;  %v1842_v41 = vmov 920167782   ;;  %v1843_v44 = vmov 1326507024   ;;  %s1845_s13 = smov 96  }
  0x6d   : > { %v443_v7 = vld [vmem:[%s2404_s9] sm:$0xf]  ;;  %s1846_s10 = smov 112   ;;  %s1847_s18 = smov 80  }
  0x6e   : > { %475 = vmatpush.bf16.msra.mxu0 %v1382_v5  ;;  %v1573_v8 = vld [vmem:[%s424_s14] ss:$0 sm:$0xff]  ;;  %s1848_s19 = smov 110   ;;  %s1849_s24 = smov 101  }
  0x6f   : > { %508 = vmatpush.bf16.msra.mxu1 %v1384_v6  ;;  %v1574_v11 = vld [vmem:[%s362_s11] ss:$0 sm:$0xff]  ;;  %s1844_s11 = smov 16   ;;  %s1850_s20 = smov 18  }
  0x70   : > { %s1851_s2 = smov 9   ;;  %s1852_s7 = smov 27  }
  0x71   : > { %1350 = vmatmul.msk.bf16.vlgmr.msra.gmra.mxu0 %vm464_vm1, %v443_v7  ;;  %s2406_s8 = sld [smem:[#allocation17_spill]]  ;;  %s1147_s23 = sshll.u32 %s2135_s28, 4  ;;  %s1148_s23 = int_to_ptr.vmem [resolvable:$true] %s1147_s23 }
  0x72   : > { %1359 = vmatmul.msk.bf16.vlgmr.msra.gmra.mxu1 %vm464_vm1, %v443_v7  ;;  %s2407_s14 = sld [smem:[#allocation18_spill]]  ;;  %s2409_s17 = sand.u32 1, %s1775_s22  }
  0x73   : > { %s2408_s15 = sld [smem:[#allocation35_spill]]  ;;  %s1133_s16 = scalar_lea.sflag [#allocation4], %s2409_s17 }
  0x77   : > { %s1375_s6 = sshll.u32 %s2406_s8, 2 }
  0x78   : > { %s1376_s30 = sshll.u32 %s2407_s14, 3 }
  0x79   : > { %s1144_s5 = sadd.s32 %s1376_s30, %s1375_s6 }
  0x7a   : > { %s1377_s29 = sshll.u32 %s1144_s5, 3 }
  0x7b   : > { %s1146_s0 = scalar_lea.hbm %s2408_s15, %s1377_s29 }
  0x7c   : > { %s1149_s9 = sshll.u32 %s1146_s0, 4  ;;  %s1150_s9 = int_to_ptr.hbm [resolvable:$true] %s1149_s9 }
  0x7d   : > { %s1679_s27 = sshra.s32 %s1150_s9, 4  ;;  %s1680_s27 = int_to_ptr.hbm [resolvable:$true] %s1679_s27 }
  0x7e   : > { %p1686_p11 = scmp.lt.s32.totalorder %s1680_s27, %s2408_s15 }
  0xee   : > { %v477_v9 = vpop.f32.mrf.mxu0 }
  0xef   : > { %v2154_v10 = vadd.f32 %v1573_v8, %v477_v9  ;;  %v510_v12 = vpop.f32.mrf.mxu1 }
  0xf0   : > { %v511_v14 = vadd.f32 %v1574_v11, %v510_v12 }
  0xf1   : > { %v518_v13 = vand.u32 2139095040, %v2154_v10  ;;  %v515_v19 = vand.u32 2147483647, %v2154_v10  ;;  %vm517_vm14 = vcmp.lt.s32.totalorder %v2154_v10, 0 }
  0xf2   : > { %v2157_v16 = vpack.c.bf16 %v511_v14, %v511_v14 }
  0xf3   : > { %v519_v15 = vshrl.u32 %v518_v13, 23  ;;  %v522_v24 = vand.u32 8388607, %v515_v19  ;;  %vm516_vm15 = vcmp.le.f32.partialorder %v515_v19, 0.7853982 }
  0xf4   : > { %v916_v18 = vunpack.c.l.b16 %v2157_v16 }
  0xf5   : > { %v1360_v17 = vadd.s32 4294967169, %v519_v15  ;;  %v523_v28 = vor.u32 8388608, %v522_v24 }
  0xf6   : > { %v479_v20 = vpop.f32.mrf.mxu0  ;;  %v2161_v22 = vpack.c.b16 %v916_v18, %v916_v18 }
  0xf7   : > { %v525_v21 = vadd.s32 1, %v1360_v17  ;;  %v512_v23 = vpop.f32.mrf.mxu1  ;;  %v2177_v51 = vshll.u32 %v523_v28, 8 }
  0xf8   : > { %918 = vrot.lane.b32.xlu2 %v2161_v22, %s1837_s4  ;;  %s1681_s4 = scalar_lea.hbm %s1680_s27, 32 }
  0xf9   : > { %vm526_vm2 = vcmp.gt.s32.totalorder %v525_v21, 0  ;;  %v564_v60 = vand.u32 65535, %v2177_v51  ;;  %v565_v61 = vshrl.u32 %v2177_v51, 16  ;;  %p1682_p4 = scmp.ne.s32.totalorder %s1680_s27, %s1681_s4 }
  0xfa   : > { %v527_v25 = vsel %vm526_vm2, %v525_v21, 0 }
  0xfb   : > { %v529_v26 = vand.u32 31, %v527_v25  ;;  %v2168_v29 = vshrl.u32 %v527_v25, 5  ;;  %p1683_p7 = pnand %p1682_p4, %p2068_p0 }
  0xfd   : > { %v2166_v27 = vsub.s32 32, %v529_v26  ;;  %v532_v31 = vshll.u32 %v1838_v30, %v529_v26  ;;  %v535_v33 = vshll.u32 %v1839_v32, %v529_v26  ;;  %v538_v37 = vshll.u32 %v1840_v35, %v529_v26  ;;  %p1684_p10 = pneg %p1683_p7 }
  0xfe   : > { %v541_v40 = vshll.u32 %v1841_v38, %v529_v26  ;;  %v544_v43 = vshll.u32 %v1842_v41, %v529_v26  ;;  %vm547_vm3 = vcmp.lt.s32.totalorder %v2168_v29, 1  ;;  %vm550_vm4 = vcmp.lt.s32.totalorder %v2168_v29, 4 }
  0xff   : > { %v533_v34 = vshrl.u32 %v1839_v32, %v2166_v27  ;;  %v536_v36 = vshrl.u32 %v1840_v35, %v2166_v27  ;;  %v539_v39 = vshrl.u32 %v1841_v38, %v2166_v27  ;;  %v542_v42 = vshrl.u32 %v1842_v41, %v2166_v27 }
 0x100   : > { %v545_v45 = vshrl.u32 %v1843_v44, %v2166_v27  ;;  %vm549_vm5 = vcmp.lt.s32.totalorder %v2168_v29, 3  ;;  %vm548_vm6 = vcmp.lt.s32.totalorder %v2168_v29, 2  ;;  %v531_v28 = vshrl.u32 %v1838_v30, %v2166_v27 }
 0x101   : > { %v534_v46 = vor.u32 %v533_v34, %v532_v31  ;;  %v537_v47 = vor.u32 %v536_v36, %v535_v33  ;;  %v540_v48 = vor.u32 %v539_v39, %v538_v37  ;;  %v543_v49 = vor.u32 %v542_v42, %v541_v40 }
 0x102   : > { %v546_v50 = vor.u32 %v545_v45, %v544_v43 }
 0x103   : > { %v555_v52 = vsel %vm547_vm3, %v534_v46, %v537_v47  ;;  %v559_v53 = vsel %vm547_vm3, %v537_v47, %v540_v48  ;;  %v556_v54 = vsel %vm550_vm4, %v543_v49, 920167782  ;;  %v552_v24 = vsel %vm550_vm4, %v540_v48, 2102212464 }
 0x104   : > { %v560_v55 = vsel %vm550_vm4, %v546_v50, 1326507024  ;;  %v557_v56 = vsel %vm549_vm5, %v540_v48, %v556_v54  ;;  %v551_v36 = vsel %vm547_vm3, %v531_v28, %v534_v46  ;;  %v553_v37 = vsel %vm549_vm5, %v537_v47, %v552_v24 }
 0x105   : > { %v561_v57 = vsel %vm549_vm5, %v543_v49, %v560_v55  ;;  %v558_v58 = vsel %vm548_vm6, %v555_v52, %v557_v56  ;;  %v554_v27 = vsel %vm548_vm6, %v551_v36, %v553_v37  ;;  %v673_v36 = vpop.permute.xlu0 %672 }
 0x106   : > { %v562_v59 = vsel %vm548_vm6, %v559_v53, %v561_v57  ;;  %v588_v0 = vand.u32 65535, %v558_v58  ;;  %v589_v1 = vshrl.u32 %v558_v58, 16  ;;  %v608_v44 = vmul.u32 %v2177_v51, %v554_v27 }
 0x107   : > { %v566_v62 = vand.u32 65535, %v562_v59  ;;  %v567_v63 = vshrl.u32 %v562_v59, 16 }
 0x108   : > { %v591_v5 = vmul.u32 %v589_v1, %v564_v60  ;;  %v592_v6 = vmul.u32 %v588_v0, %v565_v61  ;;  %v590_v11 = vmul.u32 %v588_v0, %v564_v60  ;;  %v593_v15 = vmul.u32 %v589_v1, %v565_v61 }
 0x109   : > { %v569_v2 = vmul.u32 %v567_v63, %v564_v60  ;;  %v570_v4 = vmul.u32 %v566_v62, %v565_v61  ;;  %v568_v7 = vmul.u32 %v566_v62, %v564_v60  ;;  %v571_v9 = vmul.u32 %v567_v63, %v565_v61 }
 0x10a   : > { %v594_v12 = vshll.u32 %v591_v5, 16  ;;  %v596_v18 = vshll.u32 %v592_v6, 16  ;;  %v595_v34 = vshrl.u32 %v591_v5, 16  ;;  %v597_v40 = vshrl.u32 %v592_v6, 16 }
 0x10b   : > { %v572_v8 = vshll.u32 %v569_v2, 16  ;;  %v574_v13 = vshll.u32 %v570_v4, 16  ;;  %v573_v31 = vshrl.u32 %v569_v2, 16  ;;  %v575_v38 = vshrl.u32 %v570_v4, 16 }
 0x10c   : > { %vm598_vm8 = vc.u32 %v590_v11, %v594_v12  ;;  %v600_v20 = vadd.s32 %v594_v12, %v590_v11 }
 0x10d   : > { %vm576_vm7 = vc.u32 %v568_v7, %v572_v8  ;;  %v578_v14 = vadd.s32 %v572_v8, %v568_v7  ;;  %v599_v23 = vsel %vm598_vm8, 1, %v1836_v3  ;;  %vm839_vm8 = vcmask 130048  }
 0x10e   : > { %v577_v17 = vsel %vm576_vm7, 1, %v1836_v3  ;;  %v601_v26 = vadd.s32 %v599_v23, %v593_v15  ;;  %vm602_vm10 = vc.u32 %v600_v20, %v596_v18  ;;  %v604_v43 = vadd.s32 %v600_v20, %v596_v18 }
 0x10f   : > { %v579_v21 = vadd.s32 %v577_v17, %v571_v9  ;;  %vm580_vm9 = vc.u32 %v578_v14, %v574_v13  ;;  %v603_v33 = vsel %vm602_vm10, 1, %v1836_v3  ;;  %vm658_vm7 = vweird.f32 %v2154_v10 }
 0x110   : > { %v581_v25 = vsel %vm580_vm9, 1, %v1836_v3  ;;  %v605_v35 = vadd.s32 %v603_v33, %v601_v26  ;;  %vm860_vm9 = vcmask 64512   ;;  %vm1108_vm10 = vcmask 72704  }
 0x111   : > { %v583_v32 = vadd.s32 %v581_v25, %v579_v21 }
 0x112   : > { %v606_v41 = vadd.s32 %v605_v35, %v595_v34  ;;  %v869_v34 = vsel %vm867_vm0, %v2157_v16, 0 }
 0x113   : > { %v584_v39 = vadd.s32 %v583_v32, %v573_v31  ;;  %878 = vmatpush.bf16.msra.mxu2 %v869_v34  ;;  %v1056_v34 = vld [vmem:[%s2135_s28] sm:$0xff] }
 0x114   : > { %v607_v30 = vadd.s32 %v606_v41, %v597_v40 }
 0x115   : > { %v585_v42 = vadd.s32 %v584_v39, %v575_v38 }
 0x116   : > { %v611_v3 = vadd.s32 1, %v607_v30 }
 0x117   : > { %vm610_vm11 = vc.u32 %v585_v42, %v604_v43  ;;  %v609_v29 = vadd.s32 %v604_v43, %v585_v42 }
 0x118   : > { %v612_v45 = vsel %vm610_vm11, %v611_v3, %v607_v30  ;;  %vm1118_vm11 = vcmask 220160  }
 0x119   : > { %v613_v48 = vadd.s32 %v612_v45, %v608_v44 }
 0x11b   : > { %v614_v46 = vadd.s32 536870912, %v613_v48 }
 0x11d   : > { %v615_v49 = vshrl.u32 %v614_v46, 30 }
 0x11f   : > { %v616_v50 = vshll.u32 %v615_v49, 30  ;;  %v639_v6 = vsub.s32 4, %v615_v49 }
 0x121   : > { %v617_v47 = vsub.s32 %v613_v48, %v616_v50  ;;  %v640_v12 = vsel %vm517_vm14, %v639_v6, %v615_v49 }
 0x122   : > { %v642_v15 = vsel %vm516_vm15, 0, %v640_v12 }
 0x123   : > { %vm618_vm12 = vcmp.lt.s32.totalorder %v617_v47, 0  ;;  %v619_v52 = vsub.s32 0, %v617_v47  ;;  %v659_v23 = vadd.s32 3, %v642_v15  ;;  %v821_v28 = vand.u32 3, %v642_v15 }
 0x125   : > { %v620_v53 = vsel %vm618_vm12, %v619_v52, %v617_v47  ;;  %v660_v31 = vand.u32 3, %v659_v23  ;;  %vm822_vm1 = vcmp.lt.s32.totalorder %v821_v28, 2  ;;  %vm823_vm2 = vcmp.eq.s32.totalorder %v821_v28, 0 }
 0x126   : > { %v621_v54 = vclz %v620_v53  ;;  %vm826_vm6 = vcmp.eq.s32.totalorder %v821_v28, 2  ;;  %vm1113_vm12 = vcmask 146432  }
 0x127   : > { %vm661_vm3 = vcmp.lt.s32.totalorder %v660_v31, 2  ;;  %vm662_vm4 = vcmp.eq.s32.totalorder %v660_v31, 0  ;;  %vm665_vm5 = vcmp.eq.s32.totalorder %v660_v31, 2 }
 0x128   : > { %v1361_v55 = vadd.s32 4294967294, %v621_v54 }
 0x12a   : > { %vm1362_vm13 = vcmp.lt.s32.totalorder %v1361_v55, 0 }
 0x12b   : > { %v624_v56 = vsel %vm1362_vm13, 0, %v1361_v55  ;;  %vm1127_vm13 = vcmask 293888  }
 0x12c   : > { %v625_v57 = vsub.s32 32, %v624_v56  ;;  %v629_v58 = vsub.s32 4294967266, %v624_v56  ;;  %v626_v59 = vshll.u32 %v617_v47, %v624_v56 }
 0x12e   : > { %v627_v60 = vshrl.u32 %v609_v29, %v625_v57  ;;  %v630_v61 = vadd.s32 127, %v629_v58 }
 0x130   : > { %v628_v51 = vor.u32 %v627_v60, %v626_v59  ;;  %v631_v62 = vshll.u32 %v630_v61, 23 }
 0x132   : > { %v632_v63 = vor.u32 4788187, %v631_v62  ;;  %v635_v1 = vcvt.s32.f32 %v628_v51 }
 0x134   : > { %v633_v0 = vand.u32 2147483647, %v632_v63 }
 0x136   : > { %v636_v2 = vmul.f32 %v635_v1, %v633_v0 }
 0x138   : > { %v637_v4 = vxor.u32 2147483648, %v636_v2 }
 0x13a   : > { %v638_v5 = vsel %vm517_vm14, %v637_v4, %v636_v2 }
 0x13b   : > { %v641_v7 = vsel %vm516_vm15, %v2154_v10, %v638_v5 }
 0x13c   : > { %v643_v8 = vmul.f32 %v641_v7, %v641_v7 }
 0x13e   : > { %v644_v9 = vmul.f32 -0.001358992, %v643_v8  ;;  %v651_v11 = vmul.f32 -0.00019511016, %v643_v8 }
 0x140   : > { %v645_v13 = vadd.f32 0.041655596, %v644_v9  ;;  %v652_v14 = vadd.f32 0.008332121, %v651_v11 }
 0x142   : > { %v646_v17 = vmul.f32 %v645_v13, %v643_v8  ;;  %v653_v18 = vmul.f32 %v652_v14, %v643_v8 }
 0x144   : > { %v647_v20 = vadd.f32 -0.4999988, %v646_v17  ;;  %v654_v21 = vadd.f32 -0.16666654, %v653_v18 }
 0x146   : > { %v648_v24 = vmul.f32 %v647_v20, %v643_v8  ;;  %v655_v25 = vmul.f32 %v654_v21, %v643_v8 }
 0x148   : > { %v649_v26 = vadd.f32 1.0, %v648_v24  ;;  %v656_v19 = vadd.f32 1.0, %v655_v25 }
 0x14a   : > { %v657_v32 = vmul.f32 %v656_v19, %v641_v7  ;;  %v666_v33 = vxor.u32 2147483648, %v649_v26 }
 0x14c   : > { %v663_v35 = vxor.u32 2147483648, %v657_v32  ;;  %v667_v38 = vsel %vm665_vm5, %v666_v33, %v657_v32  ;;  %v828_v40 = vsel %vm826_vm6, %v666_v33, %v657_v32 }
 0x14e   : > { %v664_v37 = vsel %vm662_vm4, %v649_v26, %v663_v35  ;;  %v825_v39 = vsel %vm823_vm2, %v649_v26, %v663_v35 }
 0x14f   : > { %v668_v41 = vsel %vm661_vm3, %v664_v37, %v667_v38  ;;  %v829_v42 = vsel %vm822_vm1, %v825_v39, %v828_v40 }
 0x150   : > { %v669_v43 = vsel %vm658_vm7, nan, %v668_v41  ;;  %v830_v27 = vsel %vm658_vm7, nan, %v829_v42  ;;  %v1057_v41 = vld [vmem:[%s2135_s28 + $0x8] sm:$0xff] }
 0x151   : > { %v675_v16 = vmul.f32 %v673_v36, %v669_v43  ;;  %v831_v30 = vmul.f32 %v830_v27, %v673_v36 }
 0x152   : > { %v919_v10 = vpop.permute.xlu2 %918 }
 0x153   : > { %v676_v3 = vpack.c.bf16 %v675_v16, %v675_v16  ;;  %v832_v44 = vpack.c.bf16 %v831_v30, %v831_v30  ;;  %v927_v52 = vsel %vm867_vm0, %v919_v10, 0 }
 0x154   : > { %936 = vmatpush.bf16.msra.mxu3 %v927_v52  ;;  %v1059_v52 = vld [vmem:[%s2135_s28 + $0x18] sm:$0xff] }
 0x155   : > { %v835_v45 = vunpack.c.l.b16 %v832_v44  ;;  %v891_v48 = vunpack.c.l.b16 %v676_v3 }
 0x157   : > { %v836_v46 = vpack.c.b16 %v835_v45, %v835_v45  ;;  %v892_v49 = vpack.c.b16 %v891_v48, %v891_v48 }
 0x159   : > { %837 = vrot.lane.b32.xlu0 %v836_v46, %s1844_s11  ;;  %948 = vrot.lane.b32.xlu2 %v892_v49, %s1845_s13 }
 0x15a   : > { %893 = vrot.lane.b32.xlu1 %v892_v49, %s1846_s10 }
 0x161   : > { %950 = vrot.lane.b32.xlu0 %v836_v46, %s1846_s10  ;;  %1002 = vrot.lane.b32.xlu2 %v892_v49, %s1847_s18  ;;  %s1685_s10 = scalar_lea.hbm %s2408_s15, 128 }
 0x162   : > { %p1687_p2 = scmp.lt.s32.totalorder %s1685_s10, %s1681_s4 }
 0x164   : > { %p1688_p12 = por %p1687_p2, %p1686_p11 }
 0x166   : > { %p1689_p1 = pnand %p1688_p12, %p1684_p10 }
 0x169   : > { %1004 = vrot.lane.b32.xlu0 %v836_v46, %s1845_s13  ;;  %972 = vrot.lane.b32.xlu2 %v2161_v22, %s1848_s19 }
 0x171   : > { %1026 = vrot.lane.b32.xlu0 %v2161_v22, %s1849_s24 }
 0x1b3   : > { %v949_v50 = vpop.permute.xlu2 %948 }
 0x1bb   : > { %v1003_v47 = vpop.permute.xlu2 %1002 }
 0x1c3   : > { %v973_v53 = vpop.permute.xlu2 %972 }
 0x1c4   : > { %v981_v54 = vsel %vm867_vm0, %v973_v53, 0 }
 0x1c5   : > { %990 = vmatpush.bf16.msrb.mxu0 %v981_v54  ;;  %1386 = vmatpush.bf16.msrb.mxu2 %v981_v54 }
 0x1cb   : > { %v838_v55 = vpop.permute.xlu0 %837 }
 0x1cc   : > { %v894_v56 = vpop.permute.xlu1 %893  ;;  %v842_v29 = vsel %vm839_vm8, %v676_v3, %v838_v55 }
 0x1cd   : > { %v897_v57 = vsel %vm839_vm8, %v894_v56, %v832_v44  ;;  %v1058_v44 = vld [vmem:[%s2135_s28 + $0x10] sm:$0xff] }
 0x1ce   : > { %1563 = vxpose.binary.xlu1.c.b16.start.end [1/2] (short) (narrow) %v897_v57, %v842_v29, 32 }
 0x1d3   : > { %v951_v58 = vpop.permute.xlu0 %950 }
 0x1d4   : > { %v954_v22 = vsel %vm839_vm8, %v949_v50, %v951_v58 }
 0x1db   : > { %v1005_v59 = vpop.permute.xlu0 %1004 }
 0x1dc   : > { %v1008_v60 = vsel %vm839_vm8, %v1003_v47, %v1005_v59 }
 0x1dd   : > { %1568 = vxpose.binary.xlu2.c.b16.start.end [1/2] (short) (narrow) %v1008_v60, %v954_v22, 32 }
 0x1e3   : > { %v1027_v61 = vpop.permute.xlu0 %1026 }
 0x1e4   : > { %v1035_v51 = vsel %vm867_vm0, %v1027_v61, 0 }
 0x1e5   : > { %1044 = vmatpush.bf16.msrb.mxu1 %v1035_v51  ;;  %1387 = vmatpush.bf16.msrb.mxu3 %v1035_v51 }
 0x27a   : > { %v1564_v62 = vpop.trf.xlu1 }
 0x27b   : > { %1366 = vmatmul.msk.bf16.vlgmr.msra.gmra.mxu2 %vm860_vm9, %v1564_v62 }
 0x27e   : > { %v1569_v63 = vpop.trf.xlu2 }
 0x27f   : > { %1370 = vmatmul.msk.bf16.vlgmr.msrb.gmra.mxu0 %vm860_vm9, %v1569_v63 }
 0x282   : > { %v1565_v0 = vpop.trf.xlu1 }
 0x283   : > { %1368 = vmatmul.msk.bf16.vlgmr.msra.gmra.mxu3 %vm860_vm9, %v1565_v0 }
 0x286   : > { %v1570_v1 = vpop.trf.xlu2 }
 0x287   : > { %1372 = vmatmul.msk.bf16.vlgmr.msrb.gmra.mxu1 %vm860_vm9, %v1570_v1 }
 0x28a   : > { %v1566_v2 = vpop.trf.xlu1 }
 0x28b   : > { %1367 = vmatmul.msk.bf16.gmra.mxu2 %vm860_vm9, %v1566_v2 }
 0x28e   : > { %v1571_v5 = vpop.trf.xlu2 }
 0x292   : > { %v1567_v4 = vpop.trf.xlu1 }
 0x293   : > { %1369 = vmatmul.msk.bf16.gmra.mxu3 %vm860_vm9, %v1567_v4 }
 0x296   : > { %v1572_v6 = vpop.trf.xlu2 }
 0x29b   : > { %1371 = vmatmul.msk.bf16.vlgmr.msrb.gmra.mxu2 %vm860_vm9, %v1571_v5 }
 0x2a3   : > { %1373 = vmatmul.msk.bf16.vlgmr.msrb.gmra.mxu3 %vm860_vm9, %v1572_v6 }
 0x2fc   : > { %v992_v7 = vpop.f32.mrf.mxu0 }
 0x2fe   : > { %v880_v12 = vpop.f32.mrf.mxu2 }
 0x304   : > { %v994_v8 = vpop.f32.mrf.mxu0  ;;  %v1046_v18 = vpop.f32.mrf.mxu1 }
 0x305   : > { %1082 = vrot.lane.b32.xlu2 %v994_v8, %s1850_s20 }
 0x306   : > { %v938_v9 = vpop.f32.mrf.mxu3  ;;  %v882_v14 = vpop.f32.mrf.mxu2 }
 0x307   : > { %1064 = vrot.lane.b32.xlu0 %v938_v9, %s1851_s2 }
 0x30c   : > { %v1048_v21 = vpop.f32.mrf.mxu1 }
 0x30e   : > { %v940_v11 = vpop.f32.mrf.mxu3  ;;  %v885_v17 = vpop.f32.mrf.mxu2 }
 0x30f   : > { %1066 = vrot.lane.b32.xlu0 %v940_v11, %s1851_s2 }
 0x316   : > { %v943_v13 = vpop.f32.mrf.mxu3  ;;  %v887_v20 = vpop.f32.mrf.mxu2 }
 0x317   : > { %1068 = vrot.lane.b32.xlu0 %v943_v13, %s1851_s2 }
 0x31e   : > { %v945_v15 = vpop.f32.mrf.mxu3  ;;  %v997_v23 = vpop.f32.mrf.mxu2 }
 0x31f   : > { %1080 = vrot.lane.b32.xlu0 %v992_v7, %s1850_s20  ;;  %1070 = vrot.lane.b32.xlu1 %v945_v15, %s1851_s2 }
 0x326   : > { %v1051_v24 = vpop.f32.mrf.mxu3  ;;  %v999_v25 = vpop.f32.mrf.mxu2 }
 0x327   : > { %1096 = vrot.lane.b32.xlu0 %v1046_v18, %s1852_s7 }
 0x32e   : > { %v1053_v26 = vpop.f32.mrf.mxu3 }
 0x32f   : > { %1098 = vrot.lane.b32.xlu0 %v1048_v21, %s1852_s7 }
 0x337   : > { %1084 = vrot.lane.b32.xlu0 %v997_v23, %s1850_s20 }
 0x33f   : > { %1100 = vrot.lane.b32.xlu0 %v1051_v24, %s1852_s7 }
 0x347   : > { %1086 = vrot.lane.b32.xlu0 %v999_v25, %s1850_s20 }
 0x34f   : > { %1102 = vrot.lane.b32.xlu0 %v1053_v26, %s1852_s7 }
 0x35f   : > { %v1083_v40 = vpop.permute.xlu2 %1082 }
 0x379   : > { %v1065_v19 = vpop.permute.xlu0 %1064 }
 0x37a   : > { %v1109_v33 = vsel %vm1108_vm10, %v880_v12, %v1065_v19 }
 0x381   : > { %v1067_v28 = vpop.permute.xlu0 %1066 }
 0x382   : > { %v1110_v39 = vsel %vm1108_vm10, %v882_v14, %v1067_v28 }
 0x383   : > { %v1115_v42 = vsel %vm1113_vm12, %v1110_v39, %v1083_v40 }
 0x389   : > { %v1069_v31 = vpop.permute.xlu0 %1068 }
 0x38a   : > { %v1111_v3 = vsel %vm1108_vm10, %v885_v17, %v1069_v31 }
 0x391   : > { %v1081_v32 = vpop.permute.xlu0 %1080  ;;  %v1071_v50 = vpop.permute.xlu1 %1070 }
 0x392   : > { %v1114_v35 = vsel %vm1113_vm12, %v1109_v33, %v1081_v32  ;;  %v1112_v47 = vsel %vm1108_vm10, %v887_v20, %v1071_v50 }
 0x399   : > { %v1097_v36 = vpop.permute.xlu0 %1096 }
 0x39a   : > { %v1119_v37 = vsel %vm1118_vm11, %v1114_v35, %v1097_v36 }
 0x39b   : > { %v1123_v38 = vadd.f32 %v1119_v37, %v1056_v34 }
 0x39d   : > { %1128 = vst.msk [vmem:[%s2135_s28] sm:$0xff] %vm1127_vm13, %v1123_v38 }
 0x3a1   : > { %v1099_v43 = vpop.permute.xlu0 %1098 }
 0x3a2   : > { %v1120_v27 = vsel %vm1118_vm11, %v1115_v42, %v1099_v43 }
 0x3a3   : > { %v1124_v16 = vadd.f32 %v1120_v27, %v1057_v41 }
 0x3a5   : > { %1129 = vst.msk [vmem:[%s2135_s28 + $0x8] sm:$0xff] %vm1127_vm13, %v1124_v16 }
 0x3a9   : > { %v1085_v30 = vpop.permute.xlu0 %1084 }
 0x3aa   : > { %v1116_v45 = vsel %vm1113_vm12, %v1111_v3, %v1085_v30 }
 0x3b1   : > { %v1101_v48 = vpop.permute.xlu0 %1100 }
 0x3b2   : > { %v1121_v46 = vsel %vm1118_vm11, %v1116_v45, %v1101_v48 }
 0x3b3   : > { %v1125_v49 = vadd.f32 %v1121_v46, %v1058_v44 }
 0x3b5   : > { %1130 = vst.msk [vmem:[%s2135_s28 + $0x10] sm:$0xff] %vm1127_vm13, %v1125_v49 }
 0x3b9   : > { %v1087_v10 = vpop.permute.xlu0 %1086 }
 0x3ba   : > { %v1117_v53 = vsel %vm1113_vm12, %v1112_v47, %v1087_v10 }
 0x3c1   : > { %v1103_v54 = vpop.permute.xlu0 %1102 }
 0x3c2   : > { %v1122_v55 = vsel %vm1118_vm11, %v1117_v53, %v1103_v54 }
 0x3c3   : > { %v1126_v56 = vadd.f32 %v1122_v55, %v1059_v52 }
 0x3c5   : > { %1131 = vst.msk [vmem:[%s2135_s28 + $0x18] sm:$0xff] %vm1127_vm13, %v1126_v56 }
 0x3c6   : > { %1692 = shalt.err (!%p1689_p1)
}
 0x3c7   : > { %s1853_s28 = smov 128   ;;  %s1854_s24 = smov 8  }
 0x3c8   : > { %1394 = dma.vmem_to_hbm [thread:$0]  (%p2068_p0), %s1148_s23, 512, %s1150_s9, %s1133_s16, %s1853_s28, %s1853_s28, %s1854_s24  }
 0x3c9 PF: > { %s2410_s20 = sld [smem:[#allocation12_spill]]  ;;  %p1411_p9 = scmp.ge.s32.totalorder %s1831_s12, 2 }
 0x3cb   : > { %p1407_p3 = pnand %p1411_p9, %p2072_p6 }
 0x3cd   : > { %p1408_p5 = pneg %p1407_p3 }
 0x3cf   : > { %s1164_s7 = sand.u32 1, %s2410_s20  }
 0x3d0   : > { %s1165_s8 = scalar_lea.sflag [#allocation4], %s1164_s7 }
 0x3d1   : > { %1766 = dma.done.wait (%p1408_p5), %s1165_s8, 512  }
 0x3d2   : > { %1768 = vsyncadd (%p1408_p5), %s1165_s8, 4294966784  ;;  %s25_s12 = sadd.s32 1, %s1831_s12   ;;  %s2413_s3 = sld [smem:[#allocation13_spill]] }
 0x3d3   : > { %p2282_p8 = scmp.ge.s32.totalorder %s25_s12, 10   ;;  %s2414_s23 = sld [smem:[#allocation27_spill]] }
 0x3d4   : > { %s2415_s6 = sld [smem:[#allocation26_spill]]  ;;  %s2425_s21 = smov %s1775_s22 }
 0x3d5   : > { %s2416_s27 = sld [smem:[#allocation14_spill]]  ;;  %s2427_s24 = smov %s1787_s25 }
 0x3d6   : > { %s2417_s28 = sld [smem:[#allocation15_spill]]  ;;  %s2428_s25 = smov %s1791_s26 }
 0x3d7   : > { %s2418_s29 = sld [smem:[#allocation25_spill]] }
 0x3d8   : > { %s2419_s30 = sld [smem:[#allocation19_spill]]  ;;  %s2426_s22 = smov %s2413_s3 }
 0x3d9   : > { %s2420_s7 = sld [smem:[#allocation20_spill]]  ;;  %24 = sbr.rel (!%p2282_p8) target bundleno = 21 (0x15), region = 126 }
 0x3da   : > { %s2421_s8 = sld [smem:[#allocation21_spill]]  ;;  %s2429_s26 = smov %s2415_s6 }
 0x3db   : > { %s2422_s9 = sld [smem:[#allocation22_spill]] }
 0x3dc   : > { %s2423_s10 = sld [smem:[#allocation23_spill]] }
 0x3dd   : > { %s2424_s11 = sld [smem:[#allocation24_spill]] }
 0x3de   :  { %1171 = vsyncpa [#allocation3], 1 }
 0x3df   :  { %1173 = vsyncpa [#allocation3 + $0x1], 1 }
 0x3e0   :  { %1174 = vsyncpa [#allocation6], 1 }
 0x3e1   :  { %1176 = vsyncpa [#allocation6 + $0x1], 1 }
 0x3e2   :  { %1177 = vsyncpa [#allocation4], 1 }
 0x3e3   :  { %1179 = vsyncpa [#allocation4 + $0x1], 1 }

</bundles_post_ra>
